<compile_context>
chip_gen: v7x
topology: tpu7x:2x2x1
jax: 0.10.0
libtpu: 0.0.40
codegen_flags: <defaults>
</compile_context>

<pallas_src>
import functools

import jax
import jax.numpy as jnp
from jax.experimental import pallas as pl
from jax.experimental.pallas import tpu as pltpu


def _round_up(x, m):
    return ((x + m - 1) // m) * m


# ----------------------------------------------------------------------------
# Kernel: encode -> reparameterize -> decode for one [TB, L] batch tile.
# ----------------------------------------------------------------------------
def vae_forward_kernel(
    x_ref, eps_ref,
    w1_ref, w23_ref, w4_ref, w5_ref, bias_ref,
    x_reconst_ref, mulv_ref,
    *, sel_len, h_dim, z_dim, zp2,
):
    # Static bias offsets inside the packed bias buffer.
    off_b1 = 0
    off_b23 = h_dim
    off_b4 = h_dim + zp2
    off_b5 = h_dim + zp2 + h_dim

    x = x_ref[...]        # [TB, L] f32
    eps = eps_ref[...]    # [TB, Z] f32

    b1 = bias_ref[:, off_b1:off_b1 + h_dim]        # [1, H]
    b23 = bias_ref[:, off_b23:off_b23 + zp2]       # [1, ZP2]
    b4 = bias_ref[:, off_b4:off_b4 + h_dim]        # [1, H]
    b5 = bias_ref[:, off_b5:off_b5 + sel_len]      # [1, L]

    # encode: h = relu(x @ W1 + b1)      (bf16 MXU inputs, f32 accumulation)
    h = jnp.dot(x.astype(jnp.bfloat16), w1_ref[...],
                preferred_element_type=jnp.float32) + b1
    h = jnp.maximum(h, 0.0)

    # fused head: [mu | log_var | pad] = h @ [W2 || W3 || 0] + [b2 || b3 || 0]
    mulv = jnp.dot(h.astype(jnp.bfloat16), w23_ref[...],
                   preferred_element_type=jnp.float32) + b23   # [TB, ZP2]
    mu = mulv[:, :z_dim]
    log_var = mulv[:, z_dim:2 * z_dim]

    # reparameterize: z = mu + eps * exp(log_var / 2)   (f32 elementwise)
    z = mu + eps * jnp.exp(log_var * 0.5)

    # decode: h2 = relu(z @ W4 + b4) ; x_reconst = sigmoid(h2 @ W5 + b5)
    h2 = jnp.dot(z.astype(jnp.bfloat16), w4_ref[...],
                 preferred_element_type=jnp.float32) + b4
    h2 = jnp.maximum(h2, 0.0)
    logits = jnp.dot(h2.astype(jnp.bfloat16), w5_ref[...],
                     preferred_element_type=jnp.float32) + b5

    x_reconst_ref[...] = jax.nn.sigmoid(logits)
    mulv_ref[...] = mulv


# ----------------------------------------------------------------------------
# Wrapper: grid over the batch dimension, weights resident in VMEM.
# ----------------------------------------------------------------------------
@jax.jit
def vae_forward(x, eps, packed):
    B, L = x.shape
    Z = eps.shape[1]
    H = packed["w1"].shape[1]
    ZP2 = packed["w23"].shape[1]
    BIAS_TOTAL = packed["bias"].shape[1]

    TB = 128 if B % 128 == 0 else B
    grid = (B // TB,)

    kernel = functools.partial(
        vae_forward_kernel, sel_len=L, h_dim=H, z_dim=Z, zp2=ZP2)

    operands = (x, eps, packed["w1"], packed["w23"], packed["w4"],
                packed["w5"], packed["bias"])

    flops = 2 * B * (L * H + H * ZP2 + Z * H + H * L)
    bytes_accessed = sum(int(a.size) * a.dtype.itemsize for a in operands)
    bytes_accessed += B * L * 4 + B * ZP2 * 4
    transcendentals = B * (Z + L)   # exp in reparam + sigmoid

    x_reconst, mulv = pl.pallas_call(
        kernel,
        out_shape=(
            jax.ShapeDtypeStruct((B, L), jnp.float32),     # x_reconst
            jax.ShapeDtypeStruct((B, ZP2), jnp.float32),   # [mu | log_var | pad]
        ),
        grid_spec=pltpu.PrefetchScalarGridSpec(
            num_scalar_prefetch=0,
            grid=grid,
            in_specs=[
                pl.BlockSpec((TB, L), lambda i: (i, 0)),          # x
                pl.BlockSpec((TB, Z), lambda i: (i, 0)),          # eps
                pl.BlockSpec((L, H), lambda i: (0, 0)),           # w1 (resident)
                pl.BlockSpec((H, ZP2), lambda i: (0, 0)),         # w23 (resident)
                pl.BlockSpec((Z, H), lambda i: (0, 0)),           # w4 (resident)
                pl.BlockSpec((H, L), lambda i: (0, 0)),           # w5 (resident)
                pl.BlockSpec((1, BIAS_TOTAL), lambda i: (0, 0)),  # packed biases
            ],
            out_specs=[
                pl.BlockSpec((TB, L), lambda i: (i, 0)),
                pl.BlockSpec((TB, ZP2), lambda i: (i, 0)),
            ],
        ),
        compiler_params=pltpu.CompilerParams(
            dimension_semantics=("parallel",)),
        cost_estimate=pl.CostEstimate(
            flops=flops,
            bytes_accessed=bytes_accessed,
            transcendentals=transcendentals),
    )(*operands)

    mu = mulv[:, :Z]
    log_var = mulv[:, Z:2 * Z]
    return x_reconst, mu, log_var


# ----------------------------------------------------------------------------
# Deterministic parameter initialization + packing.
# Raw f32 params (PyTorch-equivalent, stored [in, out]) are kept for the
# reference check; the packed set is what the kernel consumes.
# ----------------------------------------------------------------------------
def init_params(key, sel_len, h_dim, z_dim):
    keys = jax.random.split(key, 10)

    def linear(kw, kb, fan_in, fan_out):
        bound = 1.0 / jnp.sqrt(jnp.float32(fan_in))
        w = jax.random.uniform(kw, (fan_in, fan_out), jnp.float32, -bound, bound)
        b = jax.random.uniform(kb, (1, fan_out), jnp.float32, -bound, bound)
        return w, b

    w1, b1 = linear(keys[0], keys[1], sel_len, h_dim)
    w2, b2 = linear(keys[2], keys[3], h_dim, z_dim)
    w3, b3 = linear(keys[4], keys[5], h_dim, z_dim)
    w4, b4 = linear(keys[6], keys[7], z_dim, h_dim)
    w5, b5 = linear(keys[8], keys[9], h_dim, sel_len)
    raw = dict(w1=w1, b1=b1, w2=w2, b2=b2, w3=w3, b3=b3,
               w4=w4, b4=b4, w5=w5, b5=b5)

    # --- pack for the kernel ---
    zp2 = _round_up(2 * z_dim, 128)                       # lane-dense head width
    w23 = jnp.zeros((h_dim, zp2), jnp.float32)
    w23 = w23.at[:, :z_dim].set(w2).at[:, z_dim:2 * z_dim].set(w3)
    b23 = jnp.zeros((1, zp2), jnp.float32)
    b23 = b23.at[:, :z_dim].set(b2).at[:, z_dim:2 * z_dim].set(b3)

    # single packed f32 bias buffer: [b1 | b23 | b4 | b5]
    bias = jnp.concatenate([b1, b23, b4, b5], axis=1)     # [1, 2H + ZP2 + L]

    packed = dict(
        w1=w1.astype(jnp.bfloat16),
        w23=w23.astype(jnp.bfloat16),
        w4=w4.astype(jnp.bfloat16),
        w5=w5.astype(jnp.bfloat16),
        bias=bias,
    )
    return packed, raw


# ----------------------------------------------------------------------------
# References.
# ----------------------------------------------------------------------------
def vae_forward_ref_bf16(x, eps, p):
    """Mimics the kernel's bf16-matmul / f32-accumulate numerics."""
    def dot(a, w):
        return jnp.dot(a.astype(jnp.bfloat16), w.astype(jnp.bfloat16),
                       preferred_element_type=jnp.float32)
    h = jax.nn.relu(dot(x, p["w1"]) + p["b1"])
    mu = dot(h, p["w2"]) + p["b2"]
    log_var = dot(h, p["w3"]) + p["b3"]
    z = mu + eps * jnp.exp(log_var * 0.5)
    h2 = jax.nn.relu(dot(z, p["w4"]) + p["b4"])
    x_reconst = jax.nn.sigmoid(dot(h2, p["w5"]) + p["b5"])
    return x_reconst, mu, log_var


def vae_forward_ref_f32(x, eps, p):
    h = jax.nn.relu(x @ p["w1"] + p["b1"])
    mu = h @ p["w2"] + p["b2"]
    log_var = h @ p["w3"] + p["b3"]
    z = mu + eps * jnp.exp(log_var * 0.5)
    h2 = jax.nn.relu(z @ p["w4"] + p["b4"])
    x_reconst = jax.nn.sigmoid(h2 @ p["w5"] + p["b5"])
    return x_reconst, mu, log_var


if __name__ == "__main__":
    # TPU-tile-friendly sizes consistent with the module's Linear stack.
    # B >= 128 so every MXU matmul has a real M dimension; grid tiles TB=128.
    B, SEL_LEN, H_DIM, Z_DIM = 256, 128, 256, 32

    root = jax.random.PRNGKey(0)
    k_params, k_x, k_eps = jax.random.split(root, 3)

    packed, raw = init_params(k_params, SEL_LEN, H_DIM, Z_DIM)
    x = jax.random.uniform(k_x, (B, SEL_LEN), jnp.float32)   # pixel-like inputs
    eps = jax.random.normal(k_eps, (B, Z_DIM), jnp.float32)  # reparam noise
    # TODO(synk): torch.randn_like is replaced by externally supplied jax.random noise.

    x_reconst, mu, log_var = vae_forward(x, eps, packed)
    jax.block_until_ready((x_reconst, mu, log_var))

    # Tight check vs. a reference with the same bf16-matmul numerics.
    xr_b, mu_b, lv_b = vae_forward_ref_bf16(x, eps, raw)
    assert jnp.allclose(x_reconst, xr_b, atol=2e-3, rtol=2e-3)
    assert jnp.allclose(mu, mu_b, atol=2e-3, rtol=2e-3)
    assert jnp.allclose(log_var, lv_b, atol=2e-3, rtol=2e-3)

    # Loose sanity check vs. the full-f32 PyTorch-equivalent math.
    xr_f, mu_f, lv_f = vae_forward_ref_f32(x, eps, raw)
    assert jnp.allclose(x_reconst, xr_f, atol=5e-2, rtol=5e-2)
    assert jnp.allclose(mu, mu_f, atol=5e-2, rtol=5e-2)
    assert jnp.allclose(log_var, lv_f, atol=5e-2, rtol=5e-2)

    print("KERNEL_OK")
</pallas_src>

<mosaic_0001>
module attributes {stable_mosaic.version = 11 : i64} {
  func.func @vae_forward_kernel(%arg0: i32, %arg1: memref<128x128xf32, #tpu.memory_space<vmem>>, %arg2: memref<128x32xf32, #tpu.memory_space<vmem>>, %arg3: memref<128x256xbf16, #tpu.memory_space<vmem>>, %arg4: memref<256x128xbf16, #tpu.memory_space<vmem>>, %arg5: memref<32x256xbf16, #tpu.memory_space<vmem>>, %arg6: memref<256x128xbf16, #tpu.memory_space<vmem>>, %arg7: memref<1x768xf32, #tpu.memory_space<vmem>>, %arg8: memref<128x128xf32, #tpu.memory_space<vmem>>, %arg9: memref<128x128xf32, #tpu.memory_space<vmem>>) attributes {dimension_semantics = [#tpu.dimension_semantics<parallel>], iteration_bounds = array<i64: 2>, scalar_prefetch = 0 : i64, scratch_operands = 0 : i64, tpu.core_type = #tpu.core_type<tc>, window_params = [{transform_indices = @transform_0, window_bounds = array<i64: 128, 128>}, {transform_indices = @transform_1, window_bounds = array<i64: 128, 32>}, {pipeline_mode = #tpu.pipeline_mode<synchronous>, transform_indices = @transform_2, window_bounds = array<i64: 128, 256>}, {pipeline_mode = #tpu.pipeline_mode<synchronous>, transform_indices = @transform_3, window_bounds = array<i64: 256, 128>}, {pipeline_mode = #tpu.pipeline_mode<synchronous>, transform_indices = @transform_4, window_bounds = array<i64: 32, 256>}, {pipeline_mode = #tpu.pipeline_mode<synchronous>, transform_indices = @transform_5, window_bounds = array<i64: 256, 128>}, {pipeline_mode = #tpu.pipeline_mode<synchronous>, transform_indices = @transform_6, window_bounds = array<i64: 1, 768>}, {transform_indices = @transform_7, window_bounds = array<i64: 128, 128>}, {transform_indices = @transform_8, window_bounds = array<i64: 128, 128>}]} {
    %c0 = arith.constant 0 : index
    %c0_0 = arith.constant 0 : index
    %0 = vector.load %arg1[%c0, %c0_0] : memref<128x128xf32, #tpu.memory_space<vmem>>, vector<128x128xf32>
    %c0_1 = arith.constant 0 : index
    %c0_2 = arith.constant 0 : index
    %1 = vector.load %arg2[%c0_1, %c0_2] : memref<128x32xf32, #tpu.memory_space<vmem>>, vector<128x32xf32>
    %c0_3 = arith.constant 0 : index
    %c0_4 = arith.constant 0 : index
    %2 = vector.load %arg7[%c0_3, %c0_4] : memref<1x768xf32, #tpu.memory_space<vmem>>, vector<1x256xf32>
    %c0_5 = arith.constant 0 : index
    %c256 = arith.constant 256 : index
    %3 = vector.load %arg7[%c0_5, %c256] : memref<1x768xf32, #tpu.memory_space<vmem>>, vector<1x128xf32>
    %c0_6 = arith.constant 0 : index
    %c384 = arith.constant 384 : index
    %4 = vector.load %arg7[%c0_6, %c384] : memref<1x768xf32, #tpu.memory_space<vmem>>, vector<1x256xf32>
    %c0_7 = arith.constant 0 : index
    %c640 = arith.constant 640 : index
    %5 = vector.load %arg7[%c0_7, %c640] : memref<1x768xf32, #tpu.memory_space<vmem>>, vector<1x128xf32>
    %6 = arith.truncf %0 : vector<128x128xf32> to vector<128x128xbf16>
    %c0_8 = arith.constant 0 : index
    %c0_9 = arith.constant 0 : index
    %7 = vector.load %arg3[%c0_8, %c0_9] : memref<128x256xbf16, #tpu.memory_space<vmem>>, vector<128x256xbf16>
    %cst = arith.constant dense<0.000000e+00> : vector<128x256xf32>
    %8 = tpu.matmul %6, %7, %cst {dimension_numbers = #tpu.dot_dimension_numbers<[1], [0], [0], [1], [0, 0, 1, 1], [], []>} : vector<128x128xbf16>, vector<128x256xbf16>, vector<128x256xf32> -> vector<128x256xf32>
    %9 = vector.broadcast %2 : vector<1x256xf32> to vector<128x256xf32>
    %10 = arith.addf %8, %9 : vector<128x256xf32>
    %cst_10 = arith.constant 0.000000e+00 : f32
    %11 = vector.broadcast %cst_10 : f32 to vector<128x256xf32>
    %12 = arith.maximumf %10, %11 : vector<128x256xf32>
    %13 = arith.truncf %12 : vector<128x256xf32> to vector<128x256xbf16>
    %c0_11 = arith.constant 0 : index
    %c0_12 = arith.constant 0 : index
    %14 = vector.load %arg4[%c0_11, %c0_12] : memref<256x128xbf16, #tpu.memory_space<vmem>>, vector<256x128xbf16>
    %cst_13 = arith.constant dense<0.000000e+00> : vector<128x128xf32>
    %15 = tpu.matmul %13, %14, %cst_13 {dimension_numbers = #tpu.dot_dimension_numbers<[1], [0], [0], [1], [0, 0, 1, 1], [], []>} : vector<128x256xbf16>, vector<256x128xbf16>, vector<128x128xf32> -> vector<128x128xf32>
    %16 = vector.broadcast %3 : vector<1x128xf32> to vector<128x128xf32>
    %17 = arith.addf %15, %16 : vector<128x128xf32>
    %18 = vector.extract_strided_slice %17 {offsets = [0, 0], sizes = [128, 32], strides = [1, 1]} : vector<128x128xf32> to vector<128x32xf32>
    %19 = vector.extract_strided_slice %17 {offsets = [0, 32], sizes = [128, 32], strides = [1, 1]} : vector<128x128xf32> to vector<128x32xf32>
    %cst_14 = arith.constant 5.000000e-01 : f32
    %20 = vector.broadcast %cst_14 : f32 to vector<128x32xf32>
    %21 = arith.mulf %19, %20 : vector<128x32xf32>
    %22 = math.exp %21 : vector<128x32xf32>
    %23 = arith.mulf %1, %22 : vector<128x32xf32>
    %24 = arith.addf %18, %23 : vector<128x32xf32>
    %25 = arith.truncf %24 : vector<128x32xf32> to vector<128x32xbf16>
    %c0_15 = arith.constant 0 : index
    %c0_16 = arith.constant 0 : index
    %26 = vector.load %arg5[%c0_15, %c0_16] : memref<32x256xbf16, #tpu.memory_space<vmem>>, vector<32x256xbf16>
    %cst_17 = arith.constant dense<0.000000e+00> : vector<128x256xf32>
    %27 = tpu.matmul %25, %26, %cst_17 {dimension_numbers = #tpu.dot_dimension_numbers<[1], [0], [0], [1], [0, 0, 1, 1], [], []>} : vector<128x32xbf16>, vector<32x256xbf16>, vector<128x256xf32> -> vector<128x256xf32>
    %28 = vector.broadcast %4 : vector<1x256xf32> to vector<128x256xf32>
    %29 = arith.addf %27, %28 : vector<128x256xf32>
    %cst_18 = arith.constant 0.000000e+00 : f32
    %30 = vector.broadcast %cst_18 : f32 to vector<128x256xf32>
    %31 = arith.maximumf %29, %30 : vector<128x256xf32>
    %32 = arith.truncf %31 : vector<128x256xf32> to vector<128x256xbf16>
    %c0_19 = arith.constant 0 : index
    %c0_20 = arith.constant 0 : index
    %33 = vector.load %arg6[%c0_19, %c0_20] : memref<256x128xbf16, #tpu.memory_space<vmem>>, vector<256x128xbf16>
    %cst_21 = arith.constant dense<0.000000e+00> : vector<128x128xf32>
    %34 = tpu.matmul %32, %33, %cst_21 {dimension_numbers = #tpu.dot_dimension_numbers<[1], [0], [0], [1], [0, 0, 1, 1], [], []>} : vector<128x256xbf16>, vector<256x128xbf16>, vector<128x128xf32> -> vector<128x128xf32>
    %35 = vector.broadcast %5 : vector<1x128xf32> to vector<128x128xf32>
    %36 = arith.addf %34, %35 : vector<128x128xf32>
    %37 = arith.negf %36 : vector<128x128xf32>
    %38 = math.exp %37 : vector<128x128xf32>
    %cst_22 = arith.constant 1.000000e+00 : f32
    %39 = vector.broadcast %cst_22 : f32 to vector<128x128xf32>
    %40 = arith.addf %39, %38 : vector<128x128xf32>
    %41 = arith.divf %39, %40 : vector<128x128xf32>
    %c0_23 = arith.constant 0 : index
    %c0_24 = arith.constant 0 : index
    %42 = vector.load %arg8[%c0_23, %c0_24] : memref<128x128xf32, #tpu.memory_space<vmem>>, vector<128x128xf32>
    tpu.vector_store %arg8[%c0_23, %c0_24], %41 {strides = array<i32>} : memref<128x128xf32, #tpu.memory_space<vmem>>, vector<128x128xf32>,
    %c0_25 = arith.constant 0 : index
    %c0_26 = arith.constant 0 : index
    %43 = vector.load %arg9[%c0_25, %c0_26] : memref<128x128xf32, #tpu.memory_space<vmem>>, vector<128x128xf32>
    tpu.vector_store %arg9[%c0_25, %c0_26], %17 {strides = array<i32>} : memref<128x128xf32, #tpu.memory_space<vmem>>, vector<128x128xf32>,
    return
  }
  func.func @transform_0(%arg0: i32) -> (i32, i32) {
    %c0_i32 = arith.constant 0 : i32
    %c0_i32_0 = arith.constant 0 : i32
    return %arg0, %c0_i32 : i32, i32
  }
  func.func @transform_1(%arg0: i32) -> (i32, i32) {
    %c0_i32 = arith.constant 0 : i32
    %c0_i32_0 = arith.constant 0 : i32
    return %arg0, %c0_i32 : i32, i32
  }
  func.func @transform_2(%arg0: i32) -> (i32, i32) {
    %c0_i32 = arith.constant 0 : i32
    %c0_i32_0 = arith.constant 0 : i32
    %c0_i32_1 = arith.constant 0 : i32
    return %c0_i32, %c0_i32_0 : i32, i32
  }
  func.func @transform_3(%arg0: i32) -> (i32, i32) {
    %c0_i32 = arith.constant 0 : i32
    %c0_i32_0 = arith.constant 0 : i32
    %c0_i32_1 = arith.constant 0 : i32
    return %c0_i32, %c0_i32_0 : i32, i32
  }
  func.func @transform_4(%arg0: i32) -> (i32, i32) {
    %c0_i32 = arith.constant 0 : i32
    %c0_i32_0 = arith.constant 0 : i32
    %c0_i32_1 = arith.constant 0 : i32
    return %c0_i32, %c0_i32_0 : i32, i32
  }
  func.func @transform_5(%arg0: i32) -> (i32, i32) {
    %c0_i32 = arith.constant 0 : i32
    %c0_i32_0 = arith.constant 0 : i32
    %c0_i32_1 = arith.constant 0 : i32
    return %c0_i32, %c0_i32_0 : i32, i32
  }
  func.func @transform_6(%arg0: i32) -> (i32, i32) {
    %c0_i32 = arith.constant 0 : i32
    %c0_i32_0 = arith.constant 0 : i32
    %c0_i32_1 = arith.constant 0 : i32
    return %c0_i32, %c0_i32_0 : i32, i32
  }
  func.func @transform_7(%arg0: i32) -> (i32, i32) {
    %c0_i32 = arith.constant 0 : i32
    %c0_i32_0 = arith.constant 0 : i32
    return %arg0, %c0_i32 : i32, i32
  }
  func.func @transform_8(%arg0: i32) -> (i32, i32) {
    %c0_i32 = arith.constant 0 : i32
    %c0_i32_0 = arith.constant 0 : i32
    return %arg0, %c0_i32 : i32, i32
  }
}

</mosaic_0001>

<bundles_post_ra>
// kernel: vae_forward.1
= control target key start
LH: loop header
LB: loop body
LE: loop exit
PB: predicated region body
PF: predicated region fallthrough
CT: control target
= control target key end

     0   :  { %s3044_s0 = inlined_call_operand.vmem [shape: f32[256,128], index: 0, kind: input, shape index: {}]   ;;  %s3045_s1 = inlined_call_operand.vmem [shape: f32[256,32], index: 1, kind: input, shape index: {}]   ;;  %s3046_s2 = inlined_call_operand.hbm [shape: bf16[128,256], index: 2, kind: input, shape index: {}]   ;;  %s3047_s3 = inlined_call_operand.hbm [shape: bf16[256,128], index: 3, kind: input, shape index: {}]   ;;  %s3048_s4 = inlined_call_operand.vmem [shape: bf16[32,256], index: 4, kind: input, shape index: {}]   ;;  %s3049_s5 = inlined_call_operand.hbm [shape: bf16[256,128], index: 5, kind: input, shape index: {}]   ;;  %s3050_s6 = inlined_call_operand.vmem [shape: f32[1,768], index: 6, kind: input, shape index: {}]   ;;  %s3051_s7 = inlined_call_operand.hbm [shape: f32[256,128], index: 7, kind: output, shape index: {0}]   ;;  %s3052_s8 = inlined_call_operand.vmem [shape: f32[256,128], index: 8, kind: output, shape index: {1}]  }
   0x1   :  { %3061 = sst [smem:[#allocation15_spill]] %s3047_s3 }
   0x2   :  { %14 = vsyncpa [#allocation3], 0 }
   0x3   :  { %15 = vsyncpa [#allocation6], 0 }
   0x4   :  { %16 = vsyncpa [#allocation4], 0 }
   0x5   :  { %18 = vsyncpa [#allocation4 + $0x1], 0  ;;  %s2494_s27 = smov 0   ;;  %s2496_s28 = smov 0  }
   0x6   :  { %s2498_s29 = smov 0   ;;  %s2500_s30 = smov 0  }
   0x7 LB: > { %3062 = sst [smem:[#allocation12_spill]] %s2431_s29  ;;  %s2515_s9 = sadd.s32 4294967295, %s2435_s30   ;;  %s2435_s30 = sphi %s2500_s30, %s3080_s30   ;;  %s2431_s29 = sphi %s2498_s29, %s3082_s29   ;;  %s2427_s28 = sphi %s2496_s28, %s3084_s28   ;;  %s2423_s27 = sphi %s2494_s27, %s3083_s27  }
   0x8   : > { %s1816_s10 = sadd.s32 4294967294, %s2435_s30   ;;  %s2519_s11 = sadd.s32 1, %s2435_s30  }
   0x9   : > { %3063 = sst [smem:[#allocation13_spill]] %s2519_s11  ;;  %s188_s12 = sadd.s32 1, %s2431_s29 }
   0xa   : > { %s185_s13 = ssub.s32 %s2435_s30, %s2519_s11  ;;  %p198_p0 = scmp.ne.s32.totalorder %s2431_s29, %s2427_s28 }
   0xb   : > { %p186_p1 = scmp.eq.s32.totalorder %s185_s13, 0  ;;  %p199_p2 = scmp.eq.s32.totalorder %s2515_s9, 1 }
   0xc   : > { %p204_p3 = scmp.ne.s32.totalorder %s2427_s28, %s2423_s27  ;;  %p205_p4 = scmp.eq.s32.totalorder %s1816_s10, 1 }
   0xd   : > { %s2530_s14 = scalar_select %p186_p1, %s2431_s29, %s188_s12  }
   0xe   : > { %p2532_p5 = por %p199_p2, %p198_p0  ;;  %p2536_p6 = por %p205_p4, %p204_p3 }
   0xf   : > { %3064 = sst [smem:[#allocation14_spill]] %s2530_s14  ;;  %p1817_p7 = scmp.ge.s32.totalorder %s2435_s30, 1 }
  0x10   : > { %s3065_s15 = scalar_select %p2532_p5, 1, 0 }
  0x11   : > { %s3066_s16 = scalar_select %p2536_p6, 1, 0 }
  0x12   : > { %p238_p8 = scmp.lt.s32.totalorder %s2435_s30, 3  ;;  %p3053_p9 = scmp.eq.s32.totalorder %s2515_s9, 0 }
  0x13   : > { %s2437_s18 = smov [#allocation5]   ;;  %s2438_s21 = smov [#allocation2]  }
  0x14   : > { %p2543_p10 = pnand %p1817_p7, %p238_p8  ;;  %s263_s19 = sshll.u32 %s2437_s18, 4  ;;  %s264_s19 = int_to_ptr.vmem [resolvable:$true] %s263_s19 }
  0x15   : > { %s250_s22 = sshll.u32 %s2438_s21, 4  ;;  %s3069_s3 = sld [smem:[#allocation15_spill]]  ;;  %s2555_s22 = int_to_ptr.vmem [resolvable:$true] %s250_s22 }
  0x16   : > { %s3067_s17 = scalar_select %p2543_p10, 1, 0 }
  0x17   : > { %p2059_p11 = pneg %p2543_p10 }
  0x19   : > { %p2551_p12 = pnand %p3053_p9, %p2059_p11 }
  0x1b   : > { %s2281_s25 = scalar_lea.hbm %s3069_s3, 2048  ;;  %p2565_p0 = pneg %p2551_p12 }
  0x1c   : > { %p2282_p13 = scmp.ne.s32.totalorder %s3069_s3, %s2281_s25  ;;  %p2288_p3 = scmp.lt.u32.totalorder %s2281_s25, %s3069_s3 }
  0x1e   : > { %p2284_p1 = pnand %p2565_p0, %p2282_p13 }
  0x20   : > { %p2285_p2 = pneg %p2284_p1 }
  0x22   : > { %p2290_p4 = pnand %p2288_p3, %p2285_p2 }
  0x24   : > { %2293 = shalt.err (!%p2290_p4)
}
  0x25   : > { %s2294_s21 = scalar_lea.vmem %s264_s19, 2048  ;;  %p2302_p9 = scmp.lt.s32.totalorder %s264_s19, %s264_s19 }
  0x26   : > { %p2295_p7 = scmp.ne.s32.totalorder %s264_s19, %s2294_s21  ;;  %p2303_p6 = scmp.lt.s32.totalorder %s2294_s21, %s2294_s21 }
  0x28   : > { %p2297_p8 = pnand %p2295_p7, %p2565_p0  ;;  %p2304_p5 = por %p2303_p6, %p2302_p9 }
  0x2a   : > { %p2298_p11 = pneg %p2297_p8 }
  0x2c   : > { %p2305_p10 = pnand %p2304_p5, %p2298_p11 }
  0x2e   : > { %2308 = shalt.err (!%p2305_p10)
}
  0x2f   : > { %s3059_s23 = smov 64   ;;  %s3060_s24 = smov 4  }
  0x30   : > { %2065 = dma.hbm_to_vmem [thread:$0]  (!%p2551_p12), %s3069_s3, 2048, %s264_s19, [#allocation6], %s3059_s23, %s3059_s23, %s3060_s24  }
  0x31   : > { %s2309_s18 = scalar_lea.hbm %s3046_s2, 2048 }
  0x32   : > { %p2310_p5 = scmp.ne.s32.totalorder %s3046_s2, %s2309_s18  ;;  %p2316_p10 = scmp.lt.u32.totalorder %s2309_s18, %s3046_s2 }
  0x34   : > { %p2312_p6 = pnand %p2310_p5, %p2565_p0 }
  0x36   : > { %p2313_p9 = pneg %p2312_p6 }
  0x38   : > { %p2318_p13 = pnand %p2316_p10, %p2313_p9 }
  0x3a   : > { %2321 = shalt.err (!%p2318_p13)
}
  0x3b   : > { %s2322_s19 = scalar_lea.vmem %s2555_s22, 2048  ;;  %p2330_p4 = scmp.lt.s32.totalorder %s2555_s22, %s2555_s22 }
  0x3c   : > { %p2323_p1 = scmp.ne.s32.totalorder %s2555_s22, %s2322_s19  ;;  %p2331_p7 = scmp.lt.s32.totalorder %s2322_s19, %s2322_s19 }
  0x3e   : > { %p2325_p2 = pnand %p2323_p1, %p2565_p0  ;;  %p2332_p8 = por %p2331_p7, %p2330_p4 }
  0x40   : > { %p2326_p3 = pneg %p2325_p2 }
  0x42   : > { %p2333_p11 = pnand %p2332_p8, %p2326_p3 }
  0x44   : > { %2336 = shalt.err (!%p2333_p11)
}
  0x45   : > { %s2441_s14 = smov 128   ;;  %s2442_s29 = smov 8  }
  0x46   : > { %2062 = dma.hbm_to_vmem [thread:$0]  (!%p2551_p12), %s3046_s2, 2048, %s2555_s22, [#allocation3], %s2441_s14, %s2441_s14, %s2442_s29  }
  0x47   : > { %s2443_s26 = smov [#allocation7]   ;;  %s2337_s21 = scalar_lea.hbm %s3049_s5, 2048 }
  0x48   : > { %s279_s10 = sshll.u32 %s2443_s26, 4  ;;  %p2338_p5 = scmp.ne.s32.totalorder %s3049_s5, %s2337_s21  ;;  %s280_s10 = int_to_ptr.vmem [resolvable:$true] %s279_s10 }
  0x49   : > { %p2344_p10 = scmp.lt.u32.totalorder %s2337_s21, %s3049_s5 }
  0x4a   : > { %p2340_p6 = pnand %p2338_p5, %p2565_p0 }
  0x4c   : > { %p2341_p9 = pneg %p2340_p6 }
  0x4e   : > { %p2346_p13 = pnand %p2344_p10, %p2341_p9 }
  0x50   : > { %2349 = shalt.err (!%p2346_p13)
}
  0x51   : > { %s2350_s22 = scalar_lea.vmem %s280_s10, 2048  ;;  %p2358_p4 = scmp.lt.s32.totalorder %s280_s10, %s280_s10 }
  0x52   : > { %p2351_p1 = scmp.ne.s32.totalorder %s280_s10, %s2350_s22  ;;  %p2359_p7 = scmp.lt.s32.totalorder %s2350_s22, %s2350_s22 }
  0x54   : > { %p2353_p2 = pnand %p2351_p1, %p2565_p0  ;;  %p2360_p8 = por %p2359_p7, %p2358_p4 }
  0x56   : > { %p2354_p3 = pneg %p2353_p2 }
  0x58   : > { %p2361_p11 = pnand %p2360_p8, %p2354_p3 }
  0x5a   : > { %2364 = shalt.err (!%p2361_p11)
}
  0x5b   : > { %s3071_s23 = smov 4   ;;  %s3072_s14 = smov 64  }
  0x5c   : > { %2068 = dma.hbm_to_vmem [thread:$0]  (!%p2551_p12), %s3049_s5, 2048, %s280_s10, [#allocation6], %s3072_s14, %s3072_s14, %s3071_s23  }
  0x5d   : > { %p3073_p5 = scmp.ne.s32.totalorder %s3067_s17, 0 }
  0x5e   : > { %p3074_p0 = scmp.eq.s32.totalorder (!%p3073_p5), %s2515_s9, 0 }
  0x5f   : > { %316 = sbr.rel (%p3073_p5) target bundleno = 1256 (0x4e8), region = 48 }
  0x66   : > { %2410 = dma.done.wait (%p3074_p0), [#allocation3], 2048   ;;  %p3075_p6 = pmov %p3074_p0 }
  0x67   : > { %p3076_p9 = pmov %p3074_p0 }
  0x68   : > { %2412 = vsyncadd (%p3075_p6), [#allocation3], 4294965248 }
  0x69   : > { %2414 = dma.done.wait (%p3076_p9), [#allocation6], 4096   ;;  %p3077_p10 = pmov %p3074_p0 }
  0x6a   : > { %v2444_v0 = vmov 0   ;;  %v2123_v1 = vld [vmem:[#allocation2 + $0x4] ss:$8 sps:$4 sm:$0xff]   ;;  %v2125_v2 = vld [vmem:[#allocation2] ss:$8 sps:$4 sm:$0xff]   ;;  %s1827_s17 = sshll.u32 %s2515_s9, 4  ;;  %v449_v57 = vlaneseq }
  0x6b   : > { %2416 = vsyncadd (%p3077_p10), [#allocation6], 4294963200  ;;  %571 = vmatprep.mubr.bf16.mxu0 %v2444_v0  ;;  %539 = vmatprep.subr.bf16.mxu0 %v2123_v1  ;;  %v2126_v3 = vld [vmem:[#allocation2 + $0x14] ss:$8 sps:$4 sm:$0xff]   ;;  %v2128_v4 = vld [vmem:[#allocation2 + $0x10] ss:$8 sps:$4 sm:$0xff]  }
  0x6c   : > { %540 = vmatpush1.bf16.msra.mxu0 %v2125_v2  ;;  %v2129_v5 = vld [vmem:[#allocation2 + $0x24] ss:$8 sps:$4 sm:$0xff]   ;;  %v2131_v6 = vld [vmem:[#allocation2 + $0x20] ss:$8 sps:$4 sm:$0xff]   ;;  %v2132_v7 = vld [vmem:[#allocation2 + $0x34] ss:$8 sps:$4 sm:$0xff]  }
  0x6d   : > { %541 = vmatprep.subr.bf16.mxu0 %v2126_v3  ;;  %v2134_v8 = vld [vmem:[#allocation2 + $0x30] ss:$8 sps:$4 sm:$0xff]   ;;  %p369_p12 = scmp.lt.s32.totalorder %s1827_s17, 31  ;;  %v2135_v9 = vld [vmem:[#allocation2 + $0x44] ss:$8 sps:$4 sm:$0xff]   ;;  %v2672_v58 = vshrl.u32 %v449_v57, 7 }
  0x6e   : > { %v2137_v10 = vld [vmem:[#allocation2 + $0x40] ss:$8 sps:$4 sm:$0xff]   ;;  %v2138_v11 = vld [vmem:[#allocation2 + $0x54] ss:$8 sps:$4 sm:$0xff]   ;;  %v2140_v13 = vld [vmem:[#allocation2 + $0x50] ss:$8 sps:$4 sm:$0xff]  }
  0x6f   : > { %s3086_s17 = smov (!%p369_p12, %s1827_s17), 31  ;;  %v2147_v12 = vld [vmem:[#allocation5 + $0x40] sm:$0xff]   ;;  %v2149_v16 = vld [vmem:[#allocation5 + $0x48] sm:$0xff]   ;;  %v2151_v18 = vld [vmem:[#allocation5 + $0x50] sm:$0xff]   ;;  %v451_v59 = vsub.s32 0, %v2672_v58  ;;  %v455_v61 = vsub.s32 1, %v2672_v58 }
  0x70   : > { %542 = vmatpush1.bf16.msra.mxu0 %v2128_v4  ;;  %v2148_v14 = vld [vmem:[#allocation5] sm:$0xff]   ;;  %1917 = vmatprep.subr.bf16.mxu1 %v2147_v12  ;;  %s2640_s20 = sshll.u32 %s3086_s17, 3  ;;  %v2150_v17 = vld [vmem:[#allocation5 + $0x8] sm:$0xff]   ;;  %v2144_v20 = vld [vmem:[#allocation2 + $0x74] ss:$8 sps:$4 sm:$0xff]   ;;  %vm1118_vm0 = vcmask 261120  }
  0x71   : > { %543 = vmatprep.subr.bf16.mxu0 %v2129_v5  ;;  %v2141_v15 = vld [vmem:[#allocation2 + $0x64] ss:$8 sps:$4 sm:$0xff]   ;;  %1918 = vmatpush3.bf16.msra.mxu1 %v2148_v14  ;;  %v2143_v19 = vld [vmem:[#allocation2 + $0x60] ss:$8 sps:$4 sm:$0xff]   ;;  %s2646_s11 = scalar_lea.vmem %s3044_s0, %s2640_s20  ;;  %v2152_v21 = vld [vmem:[#allocation5 + $0x10] sm:$0xff]   ;;  %s2740_s29 = scalar_lea.vmem %s3052_s8, %s2640_s20 }
  0x72   : > { %1919 = vmatprep.subr.bf16.mxu1 %v2149_v16  ;;  %v2153_v22 = vld [vmem:[#allocation5 + $0x58] sm:$0xff]   ;;  %v388_v24 = vld [vmem:[%s2646_s11] sm:$0xff]  ;;  %v389_v25 = vld [vmem:[%s2646_s11 + $0x8] sm:$0xff]  ;;  %s2858_s10 = scalar_lea.vmem %s3045_s1, %s2640_s20  ;;  %s358_s19 = sand.u32 1, %s2427_s28  }
  0x73   : > { %v2146_v23 = vld [vmem:[#allocation2 + $0x70] ss:$8 sps:$4 sm:$0xff]   ;;  %v2155_v27 = vld [vmem:[#allocation5 + $0x60] sm:$0xff]   ;;  %v424_v29 = vpack.c.bf16 %v389_v25, %v388_v24  ;;  %v2157_v30 = vld [vmem:[#allocation5 + $0x68] sm:$0xff]   ;;  %s1826_s22 = sshll.u32 %s358_s19, 7  ;;  %s1916_s14 = sshll.u32 %s2515_s9, 11 }
  0x74   : > { %544 = vmatpush1.bf16.msra.mxu0 %v2131_v6  ;;  %v2154_v26 = vld [vmem:[#allocation5 + $0x18] sm:$0xff]   ;;  %v2156_v28 = vld [vmem:[#allocation5 + $0x20] sm:$0xff]   ;;  %v390_v31 = vld [vmem:[%s2646_s11 + $0x10] sm:$0xff]  ;;  %s2966_s23 = scalar_lea.vmem [#allocation8], %s1826_s22  ;;  %s2995_s12 = scalar_lea.hbm %s3051_s7, %s1916_s14 }
  0x75   : > { %545 = vmatprep.subr.bf16.mxu0 %v2132_v7  ;;  %1920 = vmatpush3.bf16.msra.mxu1 %v2150_v17  ;;  %v391_v32 = vld [vmem:[%s2646_s11 + $0x18] sm:$0xff]  ;;  %v392_v34 = vld [vmem:[%s2646_s11 + $0x20] sm:$0xff]  ;;  %v393_v35 = vld [vmem:[%s2646_s11 + $0x28] sm:$0xff]  ;;  %s1682_s3 = sshll.u32 %s2966_s23, 4  ;;  %p3078_p1 = scmp.ne.s32.totalorder %s3065_s15, 0  ;;  %s2997_s3 = int_to_ptr.vmem [resolvable:$true] %s1682_s3 }
  0x76   : > { %1921 = vmatprep.subr.bf16.mxu1 %v2151_v18  ;;  %v425_v33 = vpack.c.bf16 %v391_v32, %v390_v31  ;;  %v426_v36 = vpack.c.bf16 %v393_v35, %v392_v34  ;;  %v394_v37 = vld [vmem:[%s2646_s11 + $0x30] sm:$0xff]  ;;  %v395_v38 = vld [vmem:[%s2646_s11 + $0x38] sm:$0xff]  ;;  %v396_v40 = vld [vmem:[%s2646_s11 + $0x40] sm:$0xff]  ;;  %s2446_s9 = smov [#allocation8]  }
  0x77   : > { %v427_v39 = vpack.c.bf16 %v395_v38, %v394_v37  ;;  %v397_v41 = vld [vmem:[%s2646_s11 + $0x48] sm:$0xff]  ;;  %v398_v43 = vld [vmem:[%s2646_s11 + $0x50] sm:$0xff]  ;;  %v399_v44 = vld [vmem:[%s2646_s11 + $0x58] sm:$0xff]  ;;  %s2369_s25 = sshll.u32 %s2446_s9, 4  ;;  %s2370_s25 = int_to_ptr.vmem [resolvable:$false] %s2369_s25 }
  0x78   : > { %546 = vmatpush1.bf16.msra.mxu0 %v2134_v8  ;;  %v428_v42 = vpack.c.bf16 %v397_v41, %v396_v40  ;;  %v429_v45 = vpack.c.bf16 %v399_v44, %v398_v43  ;;  %v400_v46 = vld [vmem:[%s2646_s11 + $0x60] sm:$0xff]  ;;  %v401_v47 = vld [vmem:[%s2646_s11 + $0x68] sm:$0xff]  ;;  %v402_v49 = vld [vmem:[%s2646_s11 + $0x70] sm:$0xff]  ;;  %s2371_s26 = scalar_lea.vmem %s2370_s25, 4096  ;;  %p2372_p4 = scmp.lt.s32.totalorder %s2997_s3, %s2370_s25 }
  0x79   : > { %547 = vmatprep.subr.bf16.mxu0 %v2135_v9  ;;  %1922 = vmatpush3.bf16.msra.mxu1 %v2152_v21  ;;  %v430_v48 = vpack.c.bf16 %v401_v47, %v400_v46  ;;  %v403_v50 = vld [vmem:[%s2646_s11 + $0x78] sm:$0xff]  ;;  %v2158_v52 = vld [vmem:[#allocation5 + $0x28] sm:$0xff]   ;;  %v2159_v53 = vld [vmem:[#allocation5 + $0x70] sm:$0xff]   ;;  %s2445_s11 = smov 96  }
  0x7a   : > { %1923 = vmatprep.subr.bf16.mxu1 %v2153_v22  ;;  %v431_v51 = vpack.c.bf16 %v403_v50, %v402_v49  ;;  %v2160_v54 = vld [vmem:[#allocation5 + $0x30] sm:$0xff]   ;;  %v2161_v55 = vld [vmem:[#allocation5 + $0x78] sm:$0xff]   ;;  %v420_v60 = vld [vmem:[%s3050_s6] sm:$0x3] }
  0x7b   : > { %v2162_v56 = vld [vmem:[#allocation5 + $0x38] sm:$0xff]   ;;  %v2681_v62 = vrot.slane %v420_v60, %v451_v59  ;;  %v2685_v63 = vrot.slane %v420_v60, %v455_v61 }
  0x7c   : > { %548 = vmatpush1.bf16.msra.mxu0 %v2137_v10 }
  0x7d   : > { %549 = vmatprep.subr.bf16.mxu0 %v2138_v11  ;;  %1924 = vmatpush3.bf16.msra.mxu1 %v2154_v26 }
  0x7e   : > { %1925 = vmatprep.subr.bf16.mxu1 %v2155_v27 }
  0x80   : > { %550 = vmatpush1.bf16.msra.mxu0 %v2140_v13 }
  0x81   : > { %551 = vmatprep.subr.bf16.mxu0 %v2141_v15  ;;  %1926 = vmatpush3.bf16.msra.mxu1 %v2156_v28 }
  0x82   : > { %1927 = vmatprep.subr.bf16.mxu1 %v2157_v30 }
  0x84   : > { %552 = vmatpush1.bf16.msra.mxu0 %v2143_v19 }
  0x85   : > { %553 = vmatprep.subr.bf16.mxu0 %v2144_v20  ;;  %1928 = vmatpush3.bf16.msra.mxu1 %v2158_v52 }
  0x86   : > { %1929 = vmatprep.subr.bf16.mxu1 %v2159_v53 }
  0x88   : > { %554 = vmatpush1.bf16.msra.mxu0 %v2146_v23 }
  0x89   : > { %1930 = vmatpush3.bf16.msra.mxu1 %v2160_v54 }
  0x8a   : > { %1931 = vmatprep.subr.bf16.mxu1 %v2161_v55 }
  0x8b   : > { %572 = vmatmul.mubr.bf16.vlgmr.msra.gmra.mrb[0].mxu0 %v424_v29 }
  0x8c   : > { %581 = vmatprep.mubr.bf16.mxu0 %v2444_v0 }
  0x8d   : > { %1932 = vmatpush3.bf16.msra.mxu1 %v2162_v56 }
  0x93   : > { %582 = vmatmul.mubr.bf16.gmra.mrb[4].mxu0 %v425_v33 }
  0x94   : > { %591 = vmatprep.mubr.bf16.mxu0 %v2444_v0 }
  0x9b   : > { %592 = vmatmul.mubr.bf16.gmra.mrb[8].mxu0 %v426_v36 }
  0x9c   : > { %601 = vmatprep.mubr.bf16.mxu0 %v2444_v0 }
  0xa3   : > { %602 = vmatmul.mubr.bf16.gmra.mrb[12].mxu0 %v427_v39 }
  0xa4   : > { %611 = vmatprep.mubr.bf16.mxu0 %v2444_v0 }
  0xab   : > { %612 = vmatmul.mubr.bf16.gmra.mrb[16].mxu0 %v428_v42 }
  0xac   : > { %621 = vmatprep.mubr.bf16.mxu0 %v2444_v0 }
  0xb3   : > { %622 = vmatmul.mubr.bf16.gmra.mrb[20].mxu0 %v429_v45 }
  0xb4   : > { %631 = vmatprep.mubr.bf16.mxu0 %v2444_v0 }
  0xbb   : > { %632 = vmatmul.mubr.bf16.gmra.mrb[24].mxu0 %v430_v48 }
  0xbc   : > { %641 = vmatprep.mubr.bf16.mxu0 %v2444_v0 }
  0xc3   : > { %642 = vmatmul.mubr.bf16.gmra.mrb[28].mxu0 %v431_v51 }
  0xc4   : > { %1175 = vmatprep.mubr.bf16.mxu0 %v2444_v0 }
 0x15e   : > { %v573_v1 = vpop.f32.mrb[0].mxu0 }
 0x15f   : > { %v574_v2 = vadd.f32 %v573_v1, %v2681_v62  ;;  %v575_v3 = vpop.f32.mrb[1].mxu0 }
 0x160   : > { %v576_v4 = vadd.f32 %v575_v3, %v2685_v63  ;;  %v577_v5 = vpop.f32.mrb[2].mxu0 }
 0x161   : > { %v578_v6 = vadd.f32 %v577_v5, %v2681_v62  ;;  %v579_v7 = vpop.f32.mrb[3].mxu0  ;;  %v652_v9 = vmax.f32 %v574_v2, 0.0 }
 0x162   : > { %v580_v8 = vadd.f32 %v579_v7, %v2685_v63  ;;  %v653_v11 = vmax.f32 %v576_v4, 0.0 }
 0x163   : > { %v654_v10 = vmax.f32 %v578_v6, 0.0 }
 0x164   : > { %v655_v12 = vmax.f32 %v580_v8, 0.0 }
 0x165   : > { %v684_v13 = vpack.c.bf16 %v654_v10, %v652_v9 }
 0x166   : > { %v583_v14 = vpop.f32.mrb[4].mxu0  ;;  %v685_v15 = vpack.c.bf16 %v655_v12, %v653_v11 }
 0x167   : > { %v584_v16 = vadd.f32 %v583_v14, %v2681_v62  ;;  %v585_v17 = vpop.f32.mrb[5].mxu0 }
 0x168   : > { %v586_v18 = vadd.f32 %v585_v17, %v2685_v63  ;;  %v587_v19 = vpop.f32.mrb[6].mxu0  ;;  %866 = vmatprep.mubr.bf16.mxu1 %v685_v15 }
 0x169   : > { %v588_v20 = vadd.f32 %v587_v19, %v2681_v62  ;;  %v589_v21 = vpop.f32.mrb[7].mxu0  ;;  %867 = vmatmul.mubr.bf16.vlgmr.msra.gmra.mrb[0].mxu1 %v684_v13  ;;  %v656_v23 = vmax.f32 %v584_v16, 0.0 }
 0x16a   : > { %v590_v22 = vadd.f32 %v589_v21, %v2685_v63  ;;  %v657_v25 = vmax.f32 %v586_v18, 0.0 }
 0x16b   : > { %v658_v24 = vmax.f32 %v588_v20, 0.0 }
 0x16c   : > { %v659_v26 = vmax.f32 %v590_v22, 0.0 }
 0x16d   : > { %v686_v27 = vpack.c.bf16 %v658_v24, %v656_v23 }
 0x16e   : > { %v687_v28 = vpack.c.bf16 %v659_v26, %v657_v25  ;;  %v593_v29 = vpop.f32.mrb[8].mxu0 }
 0x16f   : > { %v594_v30 = vadd.f32 %v593_v29, %v2681_v62  ;;  %v595_v31 = vpop.f32.mrb[9].mxu0 }
 0x170   : > { %v596_v32 = vadd.f32 %v595_v31, %v2685_v63  ;;  %v597_v33 = vpop.f32.mrb[10].mxu0  ;;  %874 = vmatprep.mubr.bf16.mxu1 %v687_v28 }
 0x171   : > { %v660_v34 = vmax.f32 %v594_v30, 0.0  ;;  %v598_v35 = vadd.f32 %v597_v33, %v2681_v62  ;;  %v599_v36 = vpop.f32.mrb[11].mxu0  ;;  %875 = vmatmul.mubr.bf16.gmra.mrb[4].mxu1 %v686_v27 }
 0x172   : > { %v661_v37 = vmax.f32 %v596_v32, 0.0  ;;  %v600_v38 = vadd.f32 %v599_v36, %v2685_v63 }
 0x173   : > { %v662_v39 = vmax.f32 %v598_v35, 0.0 }
 0x174   : > { %v663_v40 = vmax.f32 %v600_v38, 0.0 }
 0x175   : > { %v688_v41 = vpack.c.bf16 %v662_v39, %v660_v34 }
 0x176   : > { %v689_v42 = vpack.c.bf16 %v663_v40, %v661_v37  ;;  %v603_v43 = vpop.f32.mrb[12].mxu0 }
 0x177   : > { %v604_v44 = vadd.f32 %v603_v43, %v2681_v62  ;;  %v605_v45 = vpop.f32.mrb[13].mxu0 }
 0x178   : > { %v606_v46 = vadd.f32 %v605_v45, %v2685_v63  ;;  %v607_v47 = vpop.f32.mrb[14].mxu0  ;;  %882 = vmatprep.mubr.bf16.mxu1 %v689_v42 }
 0x179   : > { %v664_v48 = vmax.f32 %v604_v44, 0.0  ;;  %v608_v49 = vadd.f32 %v607_v47, %v2681_v62  ;;  %v609_v50 = vpop.f32.mrb[15].mxu0  ;;  %883 = vmatmul.mubr.bf16.gmra.mrb[8].mxu1 %v688_v41 }
 0x17a   : > { %v665_v51 = vmax.f32 %v606_v46, 0.0  ;;  %v610_v52 = vadd.f32 %v609_v50, %v2685_v63 }
 0x17b   : > { %v666_v53 = vmax.f32 %v608_v49, 0.0 }
 0x17c   : > { %v667_v54 = vmax.f32 %v610_v52, 0.0 }
 0x17d   : > { %v690_v55 = vpack.c.bf16 %v666_v53, %v664_v48 }
 0x17e   : > { %v691_v56 = vpack.c.bf16 %v667_v54, %v665_v51  ;;  %v613_v57 = vpop.f32.mrb[16].mxu0 }
 0x17f   : > { %v614_v60 = vadd.f32 %v613_v57, %v2681_v62  ;;  %v615_v1 = vpop.f32.mrb[17].mxu0 }
 0x180   : > { %v616_v2 = vadd.f32 %v615_v1, %v2685_v63  ;;  %v617_v3 = vpop.f32.mrb[18].mxu0  ;;  %890 = vmatprep.mubr.bf16.mxu1 %v691_v56  ;;  %v2168_v56 = vld [vmem:[%s3048_s4 + $0x14] ss:$8 sps:$4 sm:$0xff]  }
 0x181   : > { %v668_v4 = vmax.f32 %v614_v60, 0.0  ;;  %v618_v5 = vadd.f32 %v617_v3, %v2681_v62  ;;  %v619_v6 = vpop.f32.mrb[19].mxu0  ;;  %891 = vmatmul.mubr.bf16.gmra.mrb[12].mxu1 %v690_v55  ;;  %v2163_v55 = vld [vmem:[%s3048_s4] ss:$8 sps:$4 sm:$0xff]  }
 0x182   : > { %v669_v7 = vmax.f32 %v616_v2, 0.0  ;;  %v620_v8 = vadd.f32 %v619_v6, %v2685_v63  ;;  %v2734_v60 = vld [vmem:[%s3050_s6 + $0x2] ss:$0 sm:$0xff] }
 0x183   : > { %v670_v9 = vmax.f32 %v618_v5, 0.0 }
 0x184   : > { %v671_v10 = vmax.f32 %v620_v8, 0.0 }
 0x185   : > { %v692_v11 = vpack.c.bf16 %v670_v9, %v668_v4 }
 0x186   : > { %v693_v12 = vpack.c.bf16 %v671_v10, %v669_v7  ;;  %v623_v13 = vpop.f32.mrb[20].mxu0 }
 0x187   : > { %v624_v14 = vadd.f32 %v623_v13, %v2681_v62  ;;  %v625_v15 = vpop.f32.mrb[21].mxu0 }
 0x188   : > { %v626_v16 = vadd.f32 %v625_v15, %v2685_v63  ;;  %v627_v17 = vpop.f32.mrb[22].mxu0  ;;  %898 = vmatprep.mubr.bf16.mxu1 %v693_v12 }
 0x189   : > { %v672_v18 = vmax.f32 %v624_v14, 0.0  ;;  %v628_v19 = vadd.f32 %v627_v17, %v2681_v62  ;;  %v629_v20 = vpop.f32.mrb[23].mxu0  ;;  %899 = vmatmul.mubr.bf16.gmra.mrb[16].mxu1 %v692_v11 }
 0x18a   : > { %v673_v21 = vmax.f32 %v626_v16, 0.0  ;;  %v630_v22 = vadd.f32 %v629_v20, %v2685_v63 }
 0x18b   : > { %v674_v23 = vmax.f32 %v628_v19, 0.0 }
 0x18c   : > { %v675_v24 = vmax.f32 %v630_v22, 0.0 }
 0x18d   : > { %v694_v25 = vpack.c.bf16 %v674_v23, %v672_v18 }
 0x18e   : > { %v695_v26 = vpack.c.bf16 %v675_v24, %v673_v21  ;;  %v633_v27 = vpop.f32.mrb[24].mxu0 }
 0x18f   : > { %v634_v28 = vadd.f32 %v633_v27, %v2681_v62  ;;  %v635_v29 = vpop.f32.mrb[25].mxu0 }
 0x190   : > { %v636_v30 = vadd.f32 %v635_v29, %v2685_v63  ;;  %v637_v31 = vpop.f32.mrb[26].mxu0  ;;  %906 = vmatprep.mubr.bf16.mxu1 %v695_v26 }
 0x191   : > { %v676_v32 = vmax.f32 %v634_v28, 0.0  ;;  %v638_v33 = vadd.f32 %v637_v31, %v2681_v62  ;;  %v639_v34 = vpop.f32.mrb[27].mxu0  ;;  %907 = vmatmul.mubr.bf16.gmra.mrb[20].mxu1 %v694_v25 }
 0x192   : > { %v677_v35 = vmax.f32 %v636_v30, 0.0  ;;  %v640_v36 = vadd.f32 %v639_v34, %v2685_v63 }
 0x193   : > { %v678_v37 = vmax.f32 %v638_v33, 0.0 }
 0x194   : > { %v679_v38 = vmax.f32 %v640_v36, 0.0 }
 0x195   : > { %v696_v39 = vpack.c.bf16 %v678_v37, %v676_v32 }
 0x196   : > { %v697_v40 = vpack.c.bf16 %v679_v38, %v677_v35  ;;  %v643_v41 = vpop.f32.mrb[28].mxu0 }
 0x197   : > { %v644_v42 = vadd.f32 %v643_v41, %v2681_v62  ;;  %v645_v43 = vpop.f32.mrb[29].mxu0 }
 0x198   : > { %v646_v44 = vadd.f32 %v645_v43, %v2685_v63  ;;  %v647_v45 = vpop.f32.mrb[30].mxu0  ;;  %914 = vmatprep.mubr.bf16.mxu1 %v697_v40 }
 0x199   : > { %v680_v46 = vmax.f32 %v644_v42, 0.0  ;;  %v648_v47 = vadd.f32 %v647_v45, %v2681_v62  ;;  %v649_v48 = vpop.f32.mrb[31].mxu0  ;;  %915 = vmatmul.mubr.bf16.gmra.mrb[24].mxu1 %v696_v39  ;;  %v2165_v62 = vld [vmem:[%s3048_s4 + $0x4] ss:$8 sps:$4 sm:$0xff]  }
 0x19a   : > { %v681_v49 = vmax.f32 %v646_v44, 0.0  ;;  %v650_v50 = vadd.f32 %v649_v48, %v2685_v63  ;;  %1143 = vmatprep.subr.bf16.mxu0 %v2165_v62  ;;  %v2166_v63 = vld [vmem:[%s3048_s4 + $0x10] ss:$8 sps:$4 sm:$0xff]  }
 0x19b   : > { %v682_v51 = vmax.f32 %v648_v47, 0.0  ;;  %1144 = vmatpush1.bf16.msra.mxu0 %v2163_v55 }
 0x19c   : > { %v683_v52 = vmax.f32 %v650_v50, 0.0  ;;  %1145 = vmatprep.subr.bf16.mxu0 %v2168_v56 }
 0x19d   : > { %v698_v53 = vpack.c.bf16 %v682_v51, %v680_v46 }
 0x19e   : > { %v699_v54 = vpack.c.bf16 %v683_v52, %v681_v49 }
 0x19f   : > { %1146 = vmatpush1.bf16.msra.mxu0 %v2166_v63 }
 0x1a0   : > { %922 = vmatprep.mubr.bf16.mxu1 %v699_v54 }
 0x1a1   : > { %923 = vmatmul.mubr.bf16.gmra.mrb[28].mxu1 %v698_v53 }
 0x23c   : > { %v1933_v57 = vpop.f32.mrb[0].mxu1 }
 0x23d   : > { %v1934_v1 = vpop.f32.mrb[1].mxu1 }
 0x23e   : > { %v1935_v2 = vadd.f32 %v1934_v1, %v1933_v57  ;;  %v1936_v3 = vpop.f32.mrb[2].mxu1 }
 0x23f   : > { %v1937_v4 = vpop.f32.mrb[3].mxu1 }
 0x240   : > { %v2743_v5 = vadd.f32 %v1935_v2, %v2734_v60  ;;  %v1938_v6 = vadd.f32 %v1937_v4, %v1936_v3 }
 0x242   : > { %v931_v7 = vmul.f32 0.5, %v2743_v5  ;;  %1647 = vst [vmem:[%s2740_s29] sm:$0xff] %v2743_v5  ;;  %v2749_v8 = vadd.f32 %v1938_v6, %v2734_v60 }
 0x244   : > { %v947_v9 = vmul.f32 1.442695, %v931_v7  ;;  %v932_v10 = vmul.f32 0.5, %v2749_v8  ;;  %1648 = vst [vmem:[%s2740_s29 + $0x8] sm:$0xff] %v2749_v8  ;;  %v1939_v11 = vpop.f32.mrb[4].mxu1 }
 0x245   : > { %v1940_v12 = vpop.f32.mrb[5].mxu1 }
 0x246   : > { %2185 = vpow2.f32 %v947_v9  ;;  %v949_v13 = vmul.f32 1.442695, %v932_v10  ;;  %v1941_v14 = vadd.f32 %v1940_v12, %v1939_v11  ;;  %v1942_v15 = vpop.f32.mrb[6].mxu1 }
 0x247   : > { %v1943_v16 = vpop.f32.mrb[7].mxu1 }
 0x248   : > { %v2755_v17 = vadd.f32 %v1941_v14, %v2734_v60  ;;  %v1944_v18 = vadd.f32 %v1943_v16, %v1942_v15  ;;  %2187 = vpow2.f32 %v949_v13 }
 0x24a   : > { %v933_v19 = vmul.f32 0.5, %v2755_v17  ;;  %1649 = vst [vmem:[%s2740_s29 + $0x10] sm:$0xff] %v2755_v17  ;;  %v2761_v20 = vadd.f32 %v1944_v18, %v2734_v60 }
 0x24c   : > { %v951_v21 = vmul.f32 1.442695, %v933_v19  ;;  %v934_v22 = vmul.f32 0.5, %v2761_v20  ;;  %1650 = vst [vmem:[%s2740_s29 + $0x18] sm:$0xff] %v2761_v20  ;;  %v1945_v23 = vpop.f32.mrb[8].mxu1 }
 0x24d   : > { %v1946_v24 = vpop.f32.mrb[9].mxu1 }
 0x24e   : > { %2189 = vpow2.f32 %v951_v21  ;;  %v953_v25 = vmul.f32 1.442695, %v934_v22  ;;  %v1947_v26 = vadd.f32 %v1946_v24, %v1945_v23  ;;  %v1948_v27 = vpop.f32.mrb[10].mxu1 }
 0x24f   : > { %v1949_v28 = vpop.f32.mrb[11].mxu1 }
 0x250   : > { %v2186_v29 = vpop.eup %2185  ;;  %v2767_v30 = vadd.f32 %v1947_v26, %v2734_v60  ;;  %v1950_v31 = vadd.f32 %v1949_v28, %v1948_v27  ;;  %2191 = vpow2.f32 %v953_v25 }
 0x251   : > { %995 = vrot.lane.b32.xlu0 %v2186_v29, %s2445_s11 }
 0x252   : > { %v935_v32 = vmul.f32 0.5, %v2767_v30  ;;  %1651 = vst [vmem:[%s2740_s29 + $0x20] sm:$0xff] %v2767_v30  ;;  %v2774_v33 = vadd.f32 %v1950_v31, %v2734_v60  ;;  %v2188_v34 = vpop.eup %2187 }
 0x254   : > { %v955_v35 = vmul.f32 1.442695, %v935_v32  ;;  %v936_v36 = vmul.f32 0.5, %v2774_v33  ;;  %1652 = vst [vmem:[%s2740_s29 + $0x28] sm:$0xff] %v2774_v33  ;;  %v1951_v37 = vpop.f32.mrb[12].mxu1 }
 0x255   : > { %v1952_v38 = vpop.f32.mrb[13].mxu1  ;;  %997 = vrot.lane.b32.xlu0 %v2188_v34, %s2445_s11 }
 0x256   : > { %2193 = vpow2.f32 %v955_v35  ;;  %v957_v39 = vmul.f32 1.442695, %v936_v36  ;;  %v1953_v40 = vadd.f32 %v1952_v38, %v1951_v37  ;;  %v1954_v41 = vpop.f32.mrb[14].mxu1 }
 0x257   : > { %v1955_v42 = vpop.f32.mrb[15].mxu1 }
 0x258   : > { %v2190_v43 = vpop.eup %2189  ;;  %2195 = vpow2.f32 %v957_v39  ;;  %v2781_v44 = vadd.f32 %v1953_v40, %v2734_v60  ;;  %v1956_v45 = vadd.f32 %v1955_v42, %v1954_v41 }
 0x259   : > { %999 = vrot.lane.b32.xlu1 %v2190_v43, %s2445_s11 }
 0x25a   : > { %v937_v46 = vmul.f32 0.5, %v2781_v44  ;;  %1653 = vst [vmem:[%s2740_s29 + $0x30] sm:$0xff] %v2781_v44  ;;  %v2788_v47 = vadd.f32 %v1956_v45, %v2734_v60  ;;  %v2192_v48 = vpop.eup %2191 }
 0x25c   : > { %v959_v49 = vmul.f32 1.442695, %v937_v46  ;;  %v938_v50 = vmul.f32 0.5, %v2788_v47  ;;  %1654 = vst [vmem:[%s2740_s29 + $0x38] sm:$0xff] %v2788_v47  ;;  %v1957_v51 = vpop.f32.mrb[16].mxu1 }
 0x25d   : > { %v1958_v52 = vpop.f32.mrb[17].mxu1  ;;  %1001 = vrot.lane.b32.xlu1 %v2192_v48, %s2445_s11 }
 0x25e   : > { %2197 = vpow2.f32 %v959_v49  ;;  %v961_v53 = vmul.f32 1.442695, %v938_v50  ;;  %v1959_v54 = vadd.f32 %v1958_v52, %v1957_v51  ;;  %v1960_v55 = vpop.f32.mrb[18].mxu1 }
 0x25f   : > { %v1961_v62 = vpop.f32.mrb[19].mxu1 }
 0x260   : > { %v2194_v56 = vpop.eup %2193  ;;  %2199 = vpow2.f32 %v961_v53  ;;  %v2795_v63 = vadd.f32 %v1959_v54, %v2734_v60  ;;  %v1962_v57 = vadd.f32 %v1961_v62, %v1960_v55 }
 0x261   : > { %1003 = vrot.lane.b32.xlu0 %v2194_v56, %s2445_s11 }
 0x262   : > { %v2196_v1 = vpop.eup %2195  ;;  %v939_v2 = vmul.f32 0.5, %v2795_v63  ;;  %1655 = vst [vmem:[%s2740_s29 + $0x40] sm:$0xff] %v2795_v63  ;;  %v2802_v3 = vadd.f32 %v1962_v57, %v2734_v60 }
 0x263   : > { %1005 = vrot.lane.b32.xlu1 %v2196_v1, %s2445_s11  ;;  %v2169_v1 = vld [vmem:[#allocation7 + $0x40] sm:$0xff]  }
 0x264   : > { %v963_v4 = vmul.f32 1.442695, %v939_v2  ;;  %v940_v6 = vmul.f32 0.5, %v2802_v3  ;;  %1656 = vst [vmem:[%s2740_s29 + $0x48] sm:$0xff] %v2802_v3  ;;  %v1963_v7 = vpop.f32.mrb[20].mxu1  ;;  %v2170_v2 = vld [vmem:[#allocation7] sm:$0xff]   ;;  %1981 = vmatprep.subr.bf16.mxu1 %v2169_v1 }
 0x265   : > { %v1964_v9 = vpop.f32.mrb[21].mxu1  ;;  %1982 = vmatpush3.bf16.msra.mxu1 %v2170_v2 }
 0x266   : > { %2201 = vpow2.f32 %v963_v4  ;;  %v965_v10 = vmul.f32 1.442695, %v940_v6  ;;  %v1965_v11 = vadd.f32 %v1964_v9, %v1963_v7  ;;  %v1966_v12 = vpop.f32.mrb[22].mxu1  ;;  %v2172_v6 = vld [vmem:[#allocation7 + $0x8] sm:$0xff]   ;;  %v2173_v9 = vld [vmem:[#allocation7 + $0x50] sm:$0xff]  }
 0x267   : > { %v1967_v13 = vpop.f32.mrb[23].mxu1 }
 0x268   : > { %v2198_v14 = vpop.eup %2197  ;;  %2203 = vpow2.f32 %v965_v10  ;;  %v2809_v15 = vadd.f32 %v1965_v11, %v2734_v60  ;;  %v1968_v16 = vadd.f32 %v1967_v13, %v1966_v12  ;;  %v2174_v10 = vld [vmem:[#allocation7 + $0x10] sm:$0xff]   ;;  %v2175_v11 = vld [vmem:[#allocation7 + $0x58] sm:$0xff]   ;;  %v2177_v13 = vld [vmem:[#allocation7 + $0x60] sm:$0xff]  }
 0x269   : > { %1007 = vrot.lane.b32.xlu0 %v2198_v14, %s2445_s11  ;;  %v2176_v12 = vld [vmem:[#allocation7 + $0x18] sm:$0xff]   ;;  %v2178_v14 = vld [vmem:[#allocation7 + $0x20] sm:$0xff]  }
 0x26a   : > { %v2200_v18 = vpop.eup %2199  ;;  %v941_v19 = vmul.f32 0.5, %v2809_v15  ;;  %1657 = vst [vmem:[%s2740_s29 + $0x50] sm:$0xff] %v2809_v15  ;;  %v2816_v21 = vadd.f32 %v1968_v16, %v2734_v60  ;;  %v2179_v16 = vld [vmem:[#allocation7 + $0x68] sm:$0xff]  }
 0x26b   : > { %1009 = vrot.lane.b32.xlu1 %v2200_v18, %s2445_s11  ;;  %v2180_v18 = vld [vmem:[#allocation7 + $0x28] sm:$0xff]  }
 0x26c   : > { %v967_v22 = vmul.f32 1.442695, %v941_v19  ;;  %v942_v23 = vmul.f32 0.5, %v2816_v21  ;;  %1658 = vst [vmem:[%s2740_s29 + $0x58] sm:$0xff] %v2816_v21  ;;  %v1969_v24 = vpop.f32.mrb[24].mxu1  ;;  %v2181_v19 = vld [vmem:[#allocation7 + $0x70] sm:$0xff]  }
 0x26d   : > { %v1970_v25 = vpop.f32.mrb[25].mxu1 }
 0x26e   : > { %2205 = vpow2.f32 %v967_v22  ;;  %v969_v26 = vmul.f32 1.442695, %v942_v23  ;;  %v1971_v27 = vadd.f32 %v1970_v25, %v1969_v24  ;;  %v1972_v28 = vpop.f32.mrb[26].mxu1  ;;  %v2182_v22 = vld [vmem:[#allocation7 + $0x30] sm:$0xff]   ;;  %v404_v23 = vld [vmem:[%s2858_s10] sm:$0xff]  ;;  %v405_v25 = vld [vmem:[%s2858_s10 + $0x8] sm:$0xff] }
 0x26f   : > { %v1973_v29 = vpop.f32.mrb[27].mxu1 }
 0x270   : > { %v2202_v31 = vpop.eup %2201  ;;  %2207 = vpow2.f32 %v969_v26  ;;  %v2823_v32 = vadd.f32 %v1971_v27, %v2734_v60  ;;  %v1974_v34 = vadd.f32 %v1973_v29, %v1972_v28 }
 0x271   : > { %1011 = vrot.lane.b32.xlu0 %v2202_v31, %s2445_s11 }
 0x272   : > { %v2204_v35 = vpop.eup %2203  ;;  %v943_v36 = vmul.f32 0.5, %v2823_v32  ;;  %1659 = vst [vmem:[%s2740_s29 + $0x60] sm:$0xff] %v2823_v32  ;;  %v2830_v37 = vadd.f32 %v1974_v34, %v2734_v60  ;;  %v406_v34 = vld [vmem:[%s2858_s10 + $0x10] sm:$0xff] }
 0x273   : > { %1013 = vrot.lane.b32.xlu1 %v2204_v35, %s2445_s11 }
 0x274   : > { %v971_v38 = vmul.f32 1.442695, %v943_v36  ;;  %v944_v39 = vmul.f32 0.5, %v2830_v37  ;;  %1660 = vst [vmem:[%s2740_s29 + $0x68] sm:$0xff] %v2830_v37  ;;  %v1975_v40 = vpop.f32.mrb[28].mxu1 }
 0x275   : > { %v1976_v41 = vpop.f32.mrb[29].mxu1 }
 0x276   : > { %2209 = vpow2.f32 %v971_v38  ;;  %v973_v42 = vmul.f32 1.442695, %v944_v39  ;;  %v1977_v43 = vadd.f32 %v1976_v41, %v1975_v40  ;;  %v1978_v45 = vpop.f32.mrb[30].mxu1  ;;  %v407_v38 = vld [vmem:[%s2858_s10 + $0x18] sm:$0xff] }
 0x277   : > { %v1979_v46 = vpop.f32.mrb[31].mxu1 }
 0x278   : > { %v2206_v48 = vpop.eup %2205  ;;  %2211 = vpow2.f32 %v973_v42  ;;  %v2837_v49 = vadd.f32 %v1977_v43, %v2734_v60  ;;  %v1980_v50 = vadd.f32 %v1979_v46, %v1978_v45  ;;  %v408_v43 = vld [vmem:[%s2858_s10 + $0x20] sm:$0xff]  ;;  %v409_v45 = vld [vmem:[%s2858_s10 + $0x28] sm:$0xff] }
 0x279   : > { %1015 = vrot.lane.b32.xlu0 %v2206_v48, %s2445_s11 }
 0x27a   : > { %v2208_v51 = vpop.eup %2207  ;;  %v945_v52 = vmul.f32 0.5, %v2837_v49  ;;  %1661 = vst [vmem:[%s2740_s29 + $0x70] sm:$0xff] %v2837_v49  ;;  %v2844_v53 = vadd.f32 %v1980_v50, %v2734_v60  ;;  %v2171_v60 = vld [vmem:[#allocation7 + $0x48] sm:$0xff]  }
 0x27b   : > { %1017 = vrot.lane.b32.xlu1 %v2208_v51, %s2445_s11  ;;  %1983 = vmatprep.subr.bf16.mxu1 %v2171_v60 }
 0x27c   : > { %v975_v54 = vmul.f32 1.442695, %v945_v52  ;;  %v946_v55 = vmul.f32 0.5, %v2844_v53  ;;  %1662 = vst [vmem:[%s2740_s29 + $0x78] sm:$0xff] %v2844_v53  ;;  %1984 = vmatpush3.bf16.msra.mxu1 %v2172_v6  ;;  %s3003_s29 = scalar_lea.sflag [#allocation4], %s358_s19 }
 0x27d   : > { %1985 = vmatprep.subr.bf16.mxu1 %v2173_v9 }
 0x27e   : > { %2213 = vpow2.f32 %v975_v54  ;;  %v977_v62 = vmul.f32 1.442695, %v946_v55 }
 0x280   : > { %v2210_v56 = vpop.eup %2209  ;;  %2215 = vpow2.f32 %v977_v62  ;;  %1986 = vmatpush3.bf16.msra.mxu1 %v2174_v10 }
 0x281   : > { %1019 = vrot.lane.b32.xlu0 %v2210_v56, %s2445_s11  ;;  %1987 = vmatprep.subr.bf16.mxu1 %v2175_v11 }
 0x282   : > { %v2212_v57 = vpop.eup %2211 }
 0x283   : > { %1021 = vrot.lane.b32.xlu1 %v2212_v57, %s2445_s11 }
 0x284   : > { %1988 = vmatpush3.bf16.msra.mxu1 %v2176_v12 }
 0x285   : > { %1989 = vmatprep.subr.bf16.mxu1 %v2177_v13 }
 0x288   : > { %v2214_v4 = vpop.eup %2213  ;;  %1990 = vmatpush3.bf16.msra.mxu1 %v2178_v14 }
 0x289   : > { %1023 = vrot.lane.b32.xlu0 %v2214_v4, %s2445_s11  ;;  %1991 = vmatprep.subr.bf16.mxu1 %v2179_v16 }
 0x28a   : > { %v2216_v7 = vpop.eup %2215 }
 0x28b   : > { %1025 = vrot.lane.b32.xlu1 %v2216_v7, %s2445_s11  ;;  %s2365_s11 = scalar_lea.vmem %s2997_s3, 2048 }
 0x28c   : > { %1992 = vmatpush3.bf16.msra.mxu1 %v2180_v18  ;;  %p2366_p13 = scmp.ne.s32.totalorder %s2997_s3, %s2365_s11  ;;  %p2373_p7 = scmp.lt.s32.totalorder %s2371_s26, %s2365_s11 }
 0x28d   : > { %1993 = vmatprep.subr.bf16.mxu1 %v2181_v19 }
 0x28e   : > { %p2367_p2 = pnand %p2366_p13, %p3078_p1  ;;  %p2374_p8 = por %p2373_p7, %p2372_p4 }
 0x290   : > { %1994 = vmatpush3.bf16.msra.mxu1 %v2182_v22  ;;  %p2368_p3 = pneg %p2367_p2 }
 0x292   : > { %p2375_p11 = pnand %p2374_p8, %p2368_p3 }
 0x2c3   : > { %v996_v24 = vpop.permute.xlu0 %995 }
 0x2c4   : > { %v1043_v26 = vmul.f32 %v996_v24, %v404_v23 }
 0x2c6   : > { %v1059_v29 = vadd.f32 %v1043_v26, %v2743_v5 }
 0x2c7   : > { %v998_v27 = vpop.permute.xlu0 %997 }
 0x2c8   : > { %v1044_v28 = vmul.f32 %v998_v27, %v405_v25 }
 0x2ca   : > { %v1060_v31 = vadd.f32 %v1044_v28, %v2749_v8 }
 0x2cb   : > { %v1000_v35 = vpop.permute.xlu1 %999 }
 0x2cc   : > { %v1075_v36 = vpack.c.bf16 %v1060_v31, %v1059_v29  ;;  %v1045_v39 = vmul.f32 %v1000_v35, %v406_v34  ;;  %v418_v34 = vld [vmem:[%s2858_s10 + $0x70] sm:$0xff] }
 0x2ce   : > { %1870 = vmatmul.mubr.msk.bf16.vlgmr.msra.gmra.mrb[32].mxu0 %vm1118_vm0, %v1075_v36  ;;  %v1061_v42 = vadd.f32 %v1045_v39, %v2755_v17  ;;  %v410_v17 = vld [vmem:[%s2858_s10 + $0x30] sm:$0xff] }
 0x2cf   : > { %v1002_v40 = vpop.permute.xlu1 %1001  ;;  %1185 = vmatprep.mubr.bf16.mxu0 %v2444_v0 }
 0x2d0   : > { %v1046_v41 = vmul.f32 %v1002_v40, %v407_v38 }
 0x2d2   : > { %v1062_v5 = vadd.f32 %v1046_v41, %v2761_v20  ;;  %v411_v20 = vld [vmem:[%s2858_s10 + $0x38] sm:$0xff] }
 0x2d3   : > { %v1004_v8 = vpop.permute.xlu0 %1003 }
 0x2d4   : > { %v1076_v46 = vpack.c.bf16 %v1062_v5, %v1061_v42  ;;  %v1047_v50 = vmul.f32 %v1004_v8, %v408_v43  ;;  %v422_v5 = vld [vmem:[%s3050_s6 + $0x3] sm:$0x3] }
 0x2d5   : > { %v1006_v48 = vpop.permute.xlu1 %1005  ;;  %v2912_v43 = vrot.slane %v422_v5, %v451_v59 }
 0x2d6   : > { %v1048_v51 = vmul.f32 %v1006_v48, %v409_v45  ;;  %1871 = vmatmul.mubr.msk.bf16.gmra.mrb[36].mxu0 %vm1118_vm0, %v1076_v46  ;;  %v1063_v54 = vadd.f32 %v1047_v50, %v2767_v30  ;;  %v413_v30 = vld [vmem:[%s2858_s10 + $0x48] sm:$0xff] }
 0x2d7   : > { %1195 = vmatprep.mubr.bf16.mxu0 %v2444_v0 }
 0x2d8   : > { %v1064_v52 = vadd.f32 %v1048_v51, %v2774_v33  ;;  %v412_v33 = vld [vmem:[%s2858_s10 + $0x40] sm:$0xff] }
 0x2da   : > { %v1077_v62 = vpack.c.bf16 %v1064_v52, %v1063_v54 }
 0x2db   : > { %v1008_v55 = vpop.permute.xlu0 %1007 }
 0x2dc   : > { %v1049_v57 = vmul.f32 %v1008_v55, %v410_v17 }
 0x2dd   : > { %v1010_v56 = vpop.permute.xlu1 %1009 }
 0x2de   : > { %v1050_v1 = vmul.f32 %v1010_v56, %v411_v20  ;;  %1872 = vmatmul.mubr.msk.bf16.gmra.mrb[40].mxu0 %vm1118_vm0, %v1077_v62  ;;  %v1065_v60 = vadd.f32 %v1049_v57, %v2781_v44  ;;  %v415_v44 = vld [vmem:[%s2858_s10 + $0x58] sm:$0xff] }
 0x2df   : > { %1205 = vmatprep.mubr.bf16.mxu0 %v2444_v0 }
 0x2e0   : > { %v1066_v2 = vadd.f32 %v1050_v1, %v2788_v47  ;;  %v414_v47 = vld [vmem:[%s2858_s10 + $0x50] sm:$0xff] }
 0x2e2   : > { %v1078_v6 = vpack.c.bf16 %v1066_v2, %v1065_v60 }
 0x2e3   : > { %v1012_v4 = vpop.permute.xlu0 %1011 }
 0x2e4   : > { %v1051_v9 = vmul.f32 %v1012_v4, %v412_v33 }
 0x2e5   : > { %v1014_v7 = vpop.permute.xlu1 %1013 }
 0x2e6   : > { %v1052_v10 = vmul.f32 %v1014_v7, %v413_v30  ;;  %1873 = vmatmul.mubr.msk.bf16.gmra.mrb[44].mxu0 %vm1118_vm0, %v1078_v6  ;;  %v1067_v12 = vadd.f32 %v1051_v9, %v2795_v63  ;;  %v417_v63 = vld [vmem:[%s2858_s10 + $0x68] sm:$0xff] }
 0x2e7   : > { %1215 = vmatprep.mubr.bf16.mxu0 %v2444_v0 }
 0x2e8   : > { %v1068_v11 = vadd.f32 %v1052_v10, %v2802_v3  ;;  %v416_v3 = vld [vmem:[%s2858_s10 + $0x60] sm:$0xff] }
 0x2ea   : > { %v1079_v14 = vpack.c.bf16 %v1068_v11, %v1067_v12 }
 0x2eb   : > { %v1016_v13 = vpop.permute.xlu0 %1015 }
 0x2ec   : > { %v1053_v18 = vmul.f32 %v1016_v13, %v414_v47 }
 0x2ed   : > { %v1018_v16 = vpop.permute.xlu1 %1017 }
 0x2ee   : > { %v1054_v19 = vmul.f32 %v1018_v16, %v415_v44  ;;  %1874 = vmatmul.mubr.msk.bf16.gmra.mrb[48].mxu0 %vm1118_vm0, %v1079_v14  ;;  %v1069_v23 = vadd.f32 %v1053_v18, %v2809_v15 }
 0x2ef   : > { %1225 = vmatprep.mubr.bf16.mxu0 %v2444_v0 }
 0x2f0   : > { %v1070_v22 = vadd.f32 %v1054_v19, %v2816_v21  ;;  %v419_v21 = vld [vmem:[%s2858_s10 + $0x78] sm:$0xff] }
 0x2f2   : > { %v1080_v25 = vpack.c.bf16 %v1070_v22, %v1069_v23 }
 0x2f3   : > { %v1020_v24 = vpop.permute.xlu0 %1019 }
 0x2f4   : > { %v1055_v27 = vmul.f32 %v1020_v24, %v416_v3 }
 0x2f5   : > { %v1022_v26 = vpop.permute.xlu1 %1021 }
 0x2f6   : > { %v1056_v28 = vmul.f32 %v1022_v26, %v417_v63  ;;  %1875 = vmatmul.mubr.msk.bf16.gmra.mrb[52].mxu0 %vm1118_vm0, %v1080_v25  ;;  %v1071_v31 = vadd.f32 %v1055_v27, %v2823_v32  ;;  %v2184_v32 = vld [vmem:[#allocation7 + $0x38] sm:$0xff]  }
 0x2f7   : > { %1235 = vmatprep.mubr.bf16.mxu0 %v2444_v0 }
 0x2f8   : > { %v1072_v29 = vadd.f32 %v1056_v28, %v2830_v37  ;;  %v2183_v37 = vld [vmem:[#allocation7 + $0x78] sm:$0xff]  }
 0x2f9   : > { %1995 = vmatprep.subr.bf16.mxu1 %v2183_v37 }
 0x2fa   : > { %v1081_v36 = vpack.c.bf16 %v1072_v29, %v1071_v31  ;;  %1996 = vmatpush3.bf16.msra.mxu1 %v2184_v32 }
 0x2fb   : > { %v1024_v35 = vpop.permute.xlu0 %1023 }
 0x2fc   : > { %v1057_v38 = vmul.f32 %v1024_v35, %v418_v34 }
 0x2fd   : > { %v1026_v15 = vpop.permute.xlu1 %1025 }
 0x2fe   : > { %v1058_v39 = vmul.f32 %v1026_v15, %v419_v21  ;;  %1876 = vmatmul.mubr.msk.bf16.gmra.mrb[56].mxu0 %vm1118_vm0, %v1081_v36  ;;  %v1073_v41 = vadd.f32 %v1057_v38, %v2837_v49 }
 0x2ff   : > { %1245 = vmatprep.mubr.bf16.mxu0 %v2444_v0  ;;  %v2916_v0 = vrot.slane %v422_v5, %v455_v61 }
 0x300   : > { %v1074_v40 = vadd.f32 %v1058_v39, %v2844_v53 }
 0x302   : > { %v1082_v42 = vpack.c.bf16 %v1074_v40, %v1073_v41 }
 0x306   : > { %1877 = vmatmul.mubr.msk.bf16.gmra.mrb[60].mxu0 %vm1118_vm0, %v1082_v42 }
 0x3a1   : > { %v1177_v49 = vpop.f32.mrb[32].mxu0 }
 0x3a2   : > { %v1178_v53 = vadd.f32 %v1177_v49, %v2912_v43  ;;  %v1179_v8 = vpop.f32.mrb[33].mxu0 }
 0x3a3   : > { %v1180_v45 = vadd.f32 %v1179_v8, %v2916_v0  ;;  %v1181_v46 = vpop.f32.mrb[34].mxu0 }
 0x3a4   : > { %v1182_v48 = vadd.f32 %v1181_v46, %v2912_v43  ;;  %v1183_v50 = vpop.f32.mrb[35].mxu0  ;;  %v1256_v52 = vmax.f32 %v1178_v53, 0.0 }
 0x3a5   : > { %v1184_v51 = vadd.f32 %v1183_v50, %v2916_v0  ;;  %v1257_v59 = vmax.f32 %v1180_v45, 0.0 }
 0x3a6   : > { %v1258_v54 = vmax.f32 %v1182_v48, 0.0 }
 0x3a7   : > { %v1259_v17 = vmax.f32 %v1184_v51, 0.0 }
 0x3a8   : > { %v1288_v55 = vpack.c.bf16 %v1258_v54, %v1256_v52 }
 0x3a9   : > { %v1289_v58 = vpack.c.bf16 %v1259_v17, %v1257_v59  ;;  %v1187_v61 = vpop.f32.mrb[36].mxu0 }
 0x3aa   : > { %v1188_v20 = vadd.f32 %v1187_v61, %v2912_v43  ;;  %v1189_v62 = vpop.f32.mrb[37].mxu0 }
 0x3ab   : > { %v1190_v56 = vadd.f32 %v1189_v62, %v2916_v0  ;;  %v1191_v57 = vpop.f32.mrb[38].mxu0  ;;  %1470 = vmatprep.mubr.bf16.mxu1 %v1289_v58 }
 0x3ac   : > { %v1192_v1 = vadd.f32 %v1191_v57, %v2912_v43  ;;  %v1193_v2 = vpop.f32.mrb[39].mxu0  ;;  %1471 = vmatmul.mubr.bf16.vlgmr.msra.gmra.mrb[32].mxu1 %v1288_v55  ;;  %v1260_v33 = vmax.f32 %v1188_v20, 0.0 }
 0x3ad   : > { %v1194_v60 = vadd.f32 %v1193_v2, %v2916_v0  ;;  %v1261_v30 = vmax.f32 %v1190_v56, 0.0 }
 0x3ae   : > { %v1262_v4 = vmax.f32 %v1192_v1, 0.0 }
 0x3af   : > { %v1263_v6 = vmax.f32 %v1194_v60, 0.0 }
 0x3b0   : > { %v1290_v7 = vpack.c.bf16 %v1262_v4, %v1260_v33 }
 0x3b1   : > { %v1291_v9 = vpack.c.bf16 %v1263_v6, %v1261_v30  ;;  %v1197_v10 = vpop.f32.mrb[40].mxu0 }
 0x3b2   : > { %v1198_v11 = vadd.f32 %v1197_v10, %v2912_v43  ;;  %v1199_v12 = vpop.f32.mrb[41].mxu0 }
 0x3b3   : > { %v1200_v47 = vadd.f32 %v1199_v12, %v2916_v0  ;;  %v1201_v13 = vpop.f32.mrb[42].mxu0  ;;  %1478 = vmatprep.mubr.bf16.mxu1 %v1291_v9 }
 0x3b4   : > { %v1202_v44 = vadd.f32 %v1201_v13, %v2912_v43  ;;  %v1203_v14 = vpop.f32.mrb[43].mxu0  ;;  %1479 = vmatmul.mubr.bf16.gmra.mrb[36].mxu1 %v1290_v7  ;;  %v1264_v18 = vmax.f32 %v1198_v11, 0.0 }
 0x3b5   : > { %v1204_v16 = vadd.f32 %v1203_v14, %v2916_v0  ;;  %v1265_v22 = vmax.f32 %v1200_v47, 0.0 }
 0x3b6   : > { %v1266_v19 = vmax.f32 %v1202_v44, 0.0 }
 0x3b7   : > { %v1267_v23 = vmax.f32 %v1204_v16, 0.0 }
 0x3b8   : > { %v1292_v3 = vpack.c.bf16 %v1266_v19, %v1264_v18 }
 0x3b9   : > { %v1293_v24 = vpack.c.bf16 %v1267_v23, %v1265_v22  ;;  %v1207_v63 = vpop.f32.mrb[44].mxu0 }
 0x3ba   : > { %v1208_v25 = vadd.f32 %v1207_v63, %v2912_v43  ;;  %v1209_v26 = vpop.f32.mrb[45].mxu0 }
 0x3bb   : > { %v1210_v27 = vadd.f32 %v1209_v26, %v2916_v0  ;;  %v1211_v28 = vpop.f32.mrb[46].mxu0  ;;  %1486 = vmatprep.mubr.bf16.mxu1 %v1293_v24 }
 0x3bc   : > { %v1212_v29 = vadd.f32 %v1211_v28, %v2912_v43  ;;  %v1213_v31 = vpop.f32.mrb[47].mxu0  ;;  %1487 = vmatmul.mubr.bf16.gmra.mrb[40].mxu1 %v1292_v3  ;;  %v1268_v35 = vmax.f32 %v1208_v25, 0.0 }
 0x3bd   : > { %v1214_v34 = vadd.f32 %v1213_v31, %v2916_v0  ;;  %v1269_v36 = vmax.f32 %v1210_v27, 0.0 }
 0x3be   : > { %v1270_v21 = vmax.f32 %v1212_v29, 0.0 }
 0x3bf   : > { %v1271_v15 = vmax.f32 %v1214_v34, 0.0 }
 0x3c0   : > { %v1294_v38 = vpack.c.bf16 %v1270_v21, %v1268_v35  ;;  %v2953_v21 = vld [vmem:[%s3050_s6 + $0x5] ss:$0 sm:$0xff] }
 0x3c1   : > { %v1295_v39 = vpack.c.bf16 %v1271_v15, %v1269_v36  ;;  %v1217_v40 = vpop.f32.mrb[48].mxu0 }
 0x3c2   : > { %v1218_v41 = vadd.f32 %v1217_v40, %v2912_v43  ;;  %v1219_v42 = vpop.f32.mrb[49].mxu0 }
 0x3c3   : > { %v1220_v37 = vadd.f32 %v1219_v42, %v2916_v0  ;;  %v1221_v32 = vpop.f32.mrb[50].mxu0  ;;  %1494 = vmatprep.mubr.bf16.mxu1 %v1295_v39 }
 0x3c4   : > { %v1222_v5 = vadd.f32 %v1221_v32, %v2912_v43  ;;  %v1223_v49 = vpop.f32.mrb[51].mxu0  ;;  %1495 = vmatmul.mubr.bf16.gmra.mrb[44].mxu1 %v1294_v38  ;;  %v1272_v8 = vmax.f32 %v1218_v41, 0.0 }
 0x3c5   : > { %v1224_v53 = vadd.f32 %v1223_v49, %v2916_v0  ;;  %v1273_v46 = vmax.f32 %v1220_v37, 0.0 }
 0x3c6   : > { %v1274_v45 = vmax.f32 %v1222_v5, 0.0 }
 0x3c7   : > { %v1275_v48 = vmax.f32 %v1224_v53, 0.0 }
 0x3c8   : > { %v1296_v50 = vpack.c.bf16 %v1274_v45, %v1272_v8 }
 0x3c9   : > { %v1297_v51 = vpack.c.bf16 %v1275_v48, %v1273_v46  ;;  %v1227_v52 = vpop.f32.mrb[52].mxu0 }
 0x3ca   : > { %v1228_v54 = vadd.f32 %v1227_v52, %v2912_v43  ;;  %v1229_v59 = vpop.f32.mrb[53].mxu0 }
 0x3cb   : > { %v1230_v17 = vadd.f32 %v1229_v59, %v2916_v0  ;;  %v1231_v55 = vpop.f32.mrb[54].mxu0  ;;  %1502 = vmatprep.mubr.bf16.mxu1 %v1297_v51 }
 0x3cc   : > { %v1232_v58 = vadd.f32 %v1231_v55, %v2912_v43  ;;  %v1233_v61 = vpop.f32.mrb[55].mxu0  ;;  %1503 = vmatmul.mubr.bf16.gmra.mrb[48].mxu1 %v1296_v50  ;;  %v1276_v62 = vmax.f32 %v1228_v54, 0.0 }
 0x3cd   : > { %v1234_v20 = vadd.f32 %v1233_v61, %v2916_v0  ;;  %v1277_v57 = vmax.f32 %v1230_v17, 0.0 }
 0x3ce   : > { %v1278_v56 = vmax.f32 %v1232_v58, 0.0 }
 0x3cf   : > { %v1279_v1 = vmax.f32 %v1234_v20, 0.0 }
 0x3d0   : > { %v1298_v2 = vpack.c.bf16 %v1278_v56, %v1276_v62 }
 0x3d1   : > { %v1299_v60 = vpack.c.bf16 %v1279_v1, %v1277_v57  ;;  %v1237_v33 = vpop.f32.mrb[56].mxu0 }
 0x3d2   : > { %v1238_v4 = vadd.f32 %v1237_v33, %v2912_v43  ;;  %v1239_v30 = vpop.f32.mrb[57].mxu0 }
 0x3d3   : > { %v1240_v6 = vadd.f32 %v1239_v30, %v2916_v0  ;;  %v1241_v7 = vpop.f32.mrb[58].mxu0  ;;  %1510 = vmatprep.mubr.bf16.mxu1 %v1299_v60 }
 0x3d4   : > { %v1242_v9 = vadd.f32 %v1241_v7, %v2912_v43  ;;  %v1243_v10 = vpop.f32.mrb[59].mxu0  ;;  %1511 = vmatmul.mubr.bf16.gmra.mrb[52].mxu1 %v1298_v2  ;;  %v1280_v12 = vmax.f32 %v1238_v4, 0.0 }
 0x3d5   : > { %v1244_v11 = vadd.f32 %v1243_v10, %v2916_v0  ;;  %v1281_v13 = vmax.f32 %v1240_v6, 0.0 }
 0x3d6   : > { %v1282_v47 = vmax.f32 %v1242_v9, 0.0 }
 0x3d7   : > { %v1283_v44 = vmax.f32 %v1244_v11, 0.0 }
 0x3d8   : > { %v1300_v14 = vpack.c.bf16 %v1282_v47, %v1280_v12 }
 0x3d9   : > { %v1301_v16 = vpack.c.bf16 %v1283_v44, %v1281_v13  ;;  %v1247_v18 = vpop.f32.mrb[60].mxu0 }
 0x3da   : > { %v1248_v19 = vadd.f32 %v1247_v18, %v2912_v43  ;;  %v1249_v22 = vpop.f32.mrb[61].mxu0 }
 0x3db   : > { %v1250_v23 = vadd.f32 %v1249_v22, %v2916_v0  ;;  %v1251_v3 = vpop.f32.mrb[62].mxu0  ;;  %1518 = vmatprep.mubr.bf16.mxu1 %v1301_v16 }
 0x3dc   : > { %v1252_v24 = vadd.f32 %v1251_v3, %v2912_v43  ;;  %v1253_v63 = vpop.f32.mrb[63].mxu0  ;;  %1519 = vmatmul.mubr.bf16.gmra.mrb[56].mxu1 %v1300_v14  ;;  %v1284_v26 = vmax.f32 %v1248_v19, 0.0 }
 0x3dd   : > { %v1254_v25 = vadd.f32 %v1253_v63, %v2916_v0  ;;  %v1285_v28 = vmax.f32 %v1250_v23, 0.0 }
 0x3de   : > { %v1286_v27 = vmax.f32 %v1252_v24, 0.0 }
 0x3df   : > { %v1287_v29 = vmax.f32 %v1254_v25, 0.0 }
 0x3e0   : > { %v1302_v31 = vpack.c.bf16 %v1286_v27, %v1284_v26 }
 0x3e1   : > { %v1303_v34 = vpack.c.bf16 %v1287_v29, %v1285_v28 }
 0x3e3   : > { %1526 = vmatprep.mubr.bf16.mxu1 %v1303_v34 }
 0x3e4   : > { %1527 = vmatmul.mubr.bf16.gmra.mrb[60].mxu1 %v1302_v31 }
 0x47f   : > { %v1997_v35 = vpop.f32.mrb[32].mxu1 }
 0x480   : > { %v1998_v36 = vpop.f32.mrb[33].mxu1 }
 0x481   : > { %v1999_v43 = vadd.f32 %v1998_v36, %v1997_v35  ;;  %v2000_v15 = vpop.f32.mrb[34].mxu1 }
 0x482   : > { %v2001_v38 = vpop.f32.mrb[35].mxu1 }
 0x483   : > { %v1473_v0 = vadd.f32 %v1999_v43, %v2953_v21  ;;  %v2002_v39 = vadd.f32 %v2001_v38, %v2000_v15 }
 0x485   : > { %v1895_v40 = vmul.f32 -1.442695, %v1473_v0  ;;  %v1476_v41 = vadd.f32 %v2002_v39, %v2953_v21 }
 0x487   : > { %2217 = vpow2.f32 %v1895_v40  ;;  %v1896_v42 = vmul.f32 -1.442695, %v1476_v41  ;;  %v2003_v37 = vpop.f32.mrb[36].mxu1 }
 0x488   : > { %v2004_v32 = vpop.f32.mrb[37].mxu1 }
 0x489   : > { %2219 = vpow2.f32 %v1896_v42  ;;  %v2005_v5 = vadd.f32 %v2004_v32, %v2003_v37  ;;  %v2006_v49 = vpop.f32.mrb[38].mxu1 }
 0x48a   : > { %v2007_v53 = vpop.f32.mrb[39].mxu1 }
 0x48b   : > { %v1481_v8 = vadd.f32 %v2005_v5, %v2953_v21  ;;  %v2008_v45 = vadd.f32 %v2007_v53, %v2006_v49 }
 0x48d   : > { %v1897_v46 = vmul.f32 -1.442695, %v1481_v8  ;;  %v1484_v48 = vadd.f32 %v2008_v45, %v2953_v21 }
 0x48f   : > { %2221 = vpow2.f32 %v1897_v46  ;;  %v1898_v50 = vmul.f32 -1.442695, %v1484_v48  ;;  %v2009_v51 = vpop.f32.mrb[40].mxu1 }
 0x490   : > { %v2010_v52 = vpop.f32.mrb[41].mxu1 }
 0x491   : > { %v2218_v54 = vpop.eup %2217  ;;  %2223 = vpow2.f32 %v1898_v50  ;;  %v2011_v59 = vadd.f32 %v2010_v52, %v2009_v51  ;;  %v2012_v17 = vpop.f32.mrb[42].mxu1 }
 0x492   : > { %v1583_v55 = vadd.f32 1.0, %v2218_v54  ;;  %v2013_v58 = vpop.f32.mrb[43].mxu1 }
 0x493   : > { %v2220_v61 = vpop.eup %2219  ;;  %v1489_v20 = vadd.f32 %v2011_v59, %v2953_v21  ;;  %v2014_v62 = vadd.f32 %v2013_v58, %v2012_v17 }
 0x494   : > { %2225 = vrcp.f32 %v1583_v55  ;;  %v1584_v56 = vadd.f32 1.0, %v2220_v61 }
 0x495   : > { %v1899_v57 = vmul.f32 -1.442695, %v1489_v20  ;;  %v1492_v1 = vadd.f32 %v2014_v62, %v2953_v21 }
 0x496   : > { %2227 = vrcp.f32 %v1584_v56 }
 0x497   : > { %2229 = vpow2.f32 %v1899_v57  ;;  %v1900_v2 = vmul.f32 -1.442695, %v1492_v1  ;;  %v2015_v60 = vpop.f32.mrb[44].mxu1 }
 0x498   : > { %v2016_v33 = vpop.f32.mrb[45].mxu1 }
 0x499   : > { %v2222_v4 = vpop.eup %2221  ;;  %2231 = vpow2.f32 %v1900_v2  ;;  %v2017_v30 = vadd.f32 %v2016_v33, %v2015_v60  ;;  %v2018_v6 = vpop.f32.mrb[46].mxu1 }
 0x49a   : > { %v1585_v7 = vadd.f32 1.0, %v2222_v4  ;;  %v2019_v9 = vpop.f32.mrb[47].mxu1 }
 0x49b   : > { %v2224_v10 = vpop.eup %2223  ;;  %v1497_v11 = vadd.f32 %v2017_v30, %v2953_v21  ;;  %v2020_v12 = vadd.f32 %v2019_v9, %v2018_v6 }
 0x49c   : > { %2233 = vrcp.f32 %v1585_v7  ;;  %v1586_v47 = vadd.f32 1.0, %v2224_v10 }
 0x49d   : > { %v1901_v13 = vmul.f32 -1.442695, %v1497_v11  ;;  %v1500_v44 = vadd.f32 %v2020_v12, %v2953_v21 }
 0x49e   : > { %v2226_v14 = vpop.eup %2225  ;;  %2235 = vrcp.f32 %v1586_v47 }
 0x49f   : > { %1631 = vst [vmem:[%s2966_s23] sm:$0xff] %v2226_v14  ;;  %2237 = vpow2.f32 %v1901_v13  ;;  %v1902_v16 = vmul.f32 -1.442695, %v1500_v44  ;;  %v2021_v18 = vpop.f32.mrb[48].mxu1 }
 0x4a0   : > { %v2228_v19 = vpop.eup %2227  ;;  %v2022_v22 = vpop.f32.mrb[49].mxu1 }
 0x4a1   : > { %v2230_v23 = vpop.eup %2229  ;;  %1632 = vst [vmem:[%s2966_s23 + $0x8] sm:$0xff] %v2228_v19  ;;  %2239 = vpow2.f32 %v1902_v16  ;;  %v2023_v3 = vadd.f32 %v2022_v22, %v2021_v18  ;;  %v2024_v24 = vpop.f32.mrb[50].mxu1 }
 0x4a2   : > { %v1587_v63 = vadd.f32 1.0, %v2230_v23  ;;  %v2025_v25 = vpop.f32.mrb[51].mxu1 }
 0x4a3   : > { %v2232_v26 = vpop.eup %2231  ;;  %v1505_v27 = vadd.f32 %v2023_v3, %v2953_v21  ;;  %v2026_v28 = vadd.f32 %v2025_v25, %v2024_v24 }
 0x4a4   : > { %2241 = vrcp.f32 %v1587_v63  ;;  %v1588_v29 = vadd.f32 1.0, %v2232_v26 }
 0x4a5   : > { %v1903_v31 = vmul.f32 -1.442695, %v1505_v27  ;;  %v1508_v34 = vadd.f32 %v2026_v28, %v2953_v21 }
 0x4a6   : > { %v2234_v35 = vpop.eup %2233  ;;  %2243 = vrcp.f32 %v1588_v29 }
 0x4a7   : > { %1633 = vst [vmem:[%s2966_s23 + $0x10] sm:$0xff] %v2234_v35  ;;  %2245 = vpow2.f32 %v1903_v31  ;;  %v1904_v36 = vmul.f32 -1.442695, %v1508_v34  ;;  %v2027_v43 = vpop.f32.mrb[52].mxu1 }
 0x4a8   : > { %v2236_v15 = vpop.eup %2235  ;;  %v2028_v38 = vpop.f32.mrb[53].mxu1 }
 0x4a9   : > { %v2238_v0 = vpop.eup %2237  ;;  %1634 = vst [vmem:[%s2966_s23 + $0x18] sm:$0xff] %v2236_v15  ;;  %2247 = vpow2.f32 %v1904_v36  ;;  %v2029_v39 = vadd.f32 %v2028_v38, %v2027_v43  ;;  %v2030_v40 = vpop.f32.mrb[54].mxu1 }
 0x4aa   : > { %v1589_v41 = vadd.f32 1.0, %v2238_v0  ;;  %v2031_v42 = vpop.f32.mrb[55].mxu1 }
 0x4ab   : > { %v2240_v37 = vpop.eup %2239  ;;  %v1513_v32 = vadd.f32 %v2029_v39, %v2953_v21  ;;  %v2032_v5 = vadd.f32 %v2031_v42, %v2030_v40 }
 0x4ac   : > { %2249 = vrcp.f32 %v1589_v41  ;;  %v1590_v49 = vadd.f32 1.0, %v2240_v37 }
 0x4ad   : > { %v1905_v53 = vmul.f32 -1.442695, %v1513_v32  ;;  %v1516_v8 = vadd.f32 %v2032_v5, %v2953_v21 }
 0x4ae   : > { %v2242_v45 = vpop.eup %2241  ;;  %2251 = vrcp.f32 %v1590_v49 }
 0x4af   : > { %1635 = vst [vmem:[%s2966_s23 + $0x20] sm:$0xff] %v2242_v45  ;;  %2253 = vpow2.f32 %v1905_v53  ;;  %v1906_v46 = vmul.f32 -1.442695, %v1516_v8  ;;  %v2033_v48 = vpop.f32.mrb[56].mxu1 }
 0x4b0   : > { %v2244_v50 = vpop.eup %2243  ;;  %v2034_v51 = vpop.f32.mrb[57].mxu1 }
 0x4b1   : > { %v2246_v52 = vpop.eup %2245  ;;  %1636 = vst [vmem:[%s2966_s23 + $0x28] sm:$0xff] %v2244_v50  ;;  %2255 = vpow2.f32 %v1906_v46  ;;  %v2035_v54 = vadd.f32 %v2034_v51, %v2033_v48  ;;  %v2036_v59 = vpop.f32.mrb[58].mxu1 }
 0x4b2   : > { %v1591_v17 = vadd.f32 1.0, %v2246_v52  ;;  %v2037_v55 = vpop.f32.mrb[59].mxu1 }
 0x4b3   : > { %v2248_v58 = vpop.eup %2247  ;;  %v1521_v61 = vadd.f32 %v2035_v54, %v2953_v21  ;;  %v2038_v20 = vadd.f32 %v2037_v55, %v2036_v59 }
 0x4b4   : > { %2257 = vrcp.f32 %v1591_v17  ;;  %v1592_v62 = vadd.f32 1.0, %v2248_v58 }
 0x4b5   : > { %v1907_v56 = vmul.f32 -1.442695, %v1521_v61  ;;  %v1524_v57 = vadd.f32 %v2038_v20, %v2953_v21 }
 0x4b6   : > { %v2250_v1 = vpop.eup %2249  ;;  %2259 = vrcp.f32 %v1592_v62 }
 0x4b7   : > { %1637 = vst [vmem:[%s2966_s23 + $0x30] sm:$0xff] %v2250_v1  ;;  %2261 = vpow2.f32 %v1907_v56  ;;  %v1908_v2 = vmul.f32 -1.442695, %v1524_v57  ;;  %v2039_v60 = vpop.f32.mrb[60].mxu1 }
 0x4b8   : > { %v2252_v33 = vpop.eup %2251  ;;  %v2040_v4 = vpop.f32.mrb[61].mxu1 }
 0x4b9   : > { %v2254_v30 = vpop.eup %2253  ;;  %1638 = vst [vmem:[%s2966_s23 + $0x38] sm:$0xff] %v2252_v33  ;;  %2263 = vpow2.f32 %v1908_v2  ;;  %v2041_v6 = vadd.f32 %v2040_v4, %v2039_v60  ;;  %v2042_v7 = vpop.f32.mrb[62].mxu1 }
 0x4ba   : > { %v1593_v9 = vadd.f32 1.0, %v2254_v30  ;;  %v2043_v10 = vpop.f32.mrb[63].mxu1 }
 0x4bb   : > { %v2256_v11 = vpop.eup %2255  ;;  %v1529_v12 = vadd.f32 %v2041_v6, %v2953_v21  ;;  %v2044_v47 = vadd.f32 %v2043_v10, %v2042_v7 }
 0x4bc   : > { %2265 = vrcp.f32 %v1593_v9  ;;  %v1594_v13 = vadd.f32 1.0, %v2256_v11 }
 0x4bd   : > { %v1909_v44 = vmul.f32 -1.442695, %v1529_v12  ;;  %v1532_v14 = vadd.f32 %v2044_v47, %v2953_v21 }
 0x4be   : > { %v2258_v16 = vpop.eup %2257  ;;  %2267 = vrcp.f32 %v1594_v13 }
 0x4bf   : > { %1639 = vst [vmem:[%s2966_s23 + $0x40] sm:$0xff] %v2258_v16  ;;  %2269 = vpow2.f32 %v1909_v44  ;;  %v1910_v18 = vmul.f32 -1.442695, %v1532_v14 }
 0x4c0   : > { %v2260_v19 = vpop.eup %2259 }
 0x4c1   : > { %v2262_v22 = vpop.eup %2261  ;;  %1640 = vst [vmem:[%s2966_s23 + $0x48] sm:$0xff] %v2260_v19  ;;  %2271 = vpow2.f32 %v1910_v18 }
 0x4c2   : > { %v1595_v23 = vadd.f32 1.0, %v2262_v22 }
 0x4c3   : > { %v2264_v3 = vpop.eup %2263 }
 0x4c4   : > { %2273 = vrcp.f32 %v1595_v23  ;;  %v1596_v24 = vadd.f32 1.0, %v2264_v3 }
 0x4c6   : > { %v2266_v63 = vpop.eup %2265  ;;  %2275 = vrcp.f32 %v1596_v24 }
 0x4c7   : > { %1641 = vst [vmem:[%s2966_s23 + $0x50] sm:$0xff] %v2266_v63 }
 0x4c8   : > { %v2268_v21 = vpop.eup %2267 }
 0x4c9   : > { %v2270_v25 = vpop.eup %2269  ;;  %1642 = vst [vmem:[%s2966_s23 + $0x58] sm:$0xff] %v2268_v21 }
 0x4ca   : > { %v1597_v26 = vadd.f32 1.0, %v2270_v25 }
 0x4cb   : > { %v2272_v27 = vpop.eup %2271 }
 0x4cc   : > { %2277 = vrcp.f32 %v1597_v26  ;;  %v1598_v28 = vadd.f32 1.0, %v2272_v27 }
 0x4ce   : > { %v2274_v29 = vpop.eup %2273  ;;  %2279 = vrcp.f32 %v1598_v28 }
 0x4cf   : > { %1643 = vst [vmem:[%s2966_s23 + $0x60] sm:$0xff] %v2274_v29 }
 0x4d0   : > { %v2276_v31 = vpop.eup %2275 }
 0x4d1   : > { %1644 = vst [vmem:[%s2966_s23 + $0x68] sm:$0xff] %v2276_v31 }
 0x4d6   : > { %v2278_v34 = vpop.eup %2277 }
 0x4d7   : > { %1645 = vst [vmem:[%s2966_s23 + $0x70] sm:$0xff] %v2278_v34 }
 0x4d8   : > { %v2280_v35 = vpop.eup %2279 }
 0x4d9   : > { %1646 = vst [vmem:[%s2966_s23 + $0x78] sm:$0xff] %v2280_v35 }
 0x4da   : > { %2378 = shalt.err (!%p2375_p11)
}
 0x4db   : > { %s2379_s10 = scalar_lea.hbm %s2995_s12, 2048  ;;  %s2383_s18 = scalar_lea.hbm %s3051_s7, 4096 }
 0x4dc   : > { %p2380_p5 = scmp.ne.s32.totalorder %s2995_s12, %s2379_s10  ;;  %p2384_p9 = scmp.lt.u32.totalorder %s2995_s12, %s3051_s7 }
 0x4dd   : > { %p2385_p10 = scmp.lt.u32.totalorder %s2383_s18, %s2379_s10  ;;  %p2387_p13 = scmp.lt.u32.totalorder %s2379_s10, %s2995_s12 }
 0x4de   : > { %p2381_p0 = pnand %p2380_p5, %p3078_p1 }
 0x4df   : > { %p2386_p12 = por %p2385_p10, %p2384_p9 }
 0x4e0   : > { %p2382_p6 = pneg %p2381_p0 }
 0x4e1   : > { %p2388_p2 = por %p2387_p13, %p2386_p12 }
 0x4e3   : > { %p2389_p3 = pnand %p2388_p2, %p2382_p6 }
 0x4e5   : > { %2392 = shalt.err (!%p2389_p3)
}
 0x4e6   : > { %s2447_s22 = smov 128   ;;  %s2448_s23 = smov 8  }
 0x4e7   : > { %2057 = dma.vmem_to_hbm [thread:$0]  (%p3078_p1), %s2997_s3, 2048, %s2995_s12, %s3003_s29, %s2447_s22, %s2447_s22, %s2448_s23  }
 0x4e8 PF: > { %p2079_p4 = scmp.ge.s32.totalorder %s2435_s30, 2  ;;  %s1701_s14 = sand.u32 1, %s2423_s27  }
 0x4e9   : > { %p3079_p7 = scmp.ne.s32.totalorder %s3066_s16, 0  ;;  %s1702_s24 = scalar_lea.sflag [#allocation4], %s1701_s14 }
 0x4eb   : > { %p2070_p8 = pnand %p2079_p4, %p3079_p7 }
 0x4ed   : > { %2418 = dma.done.wait (!%p2070_p8), %s1702_s24, 2048  }
 0x4ee   : > { %2420 = vsyncadd (!%p2070_p8), %s1702_s24, 4294965248  ;;  %s3080_s30 = sld [smem:[#allocation13_spill]]  ;;  %s3081_s17 = sld [smem:[#allocation12_spill]] }
 0x4ef   : > { %s3082_s29 = sld [smem:[#allocation14_spill]]  ;;  %s3083_s27 = smov %s2427_s28 }
 0x4f4   : > { %p21_p11 = scmp.ge.s32.totalorder %s3080_s30, 4   ;;  %s3084_s28 = smov %s3081_s17 }
 0x4f6   :  { %23 = sbr.rel (!%p21_p11) target bundleno = 7 (0x7), region = 111 }
 0x4fd   :  { %1715 = vsyncpa [#allocation3], 1 }
 0x4fe   :  { %1717 = vsyncpa [#allocation3 + $0x1], 1 }
 0x4ff   :  { %1718 = vsyncpa [#allocation6], 1 }
 0x500   :  { %1719 = vsyncpa [#allocation4], 1 }
 0x501   :  { %1721 = vsyncpa [#allocation4 + $0x1], 1 }

</bundles_post_ra>
